<compile_context>
chip_gen: v6e
topology: v6e:2x2x1
jax: 0.10.0
libtpu: 0.0.40
codegen_flags: <defaults>
</compile_context>

<pallas_src>
import functools
import math

import jax
import jax.numpy as jnp
from jax import lax
from jax.experimental import pallas as pl
from jax.experimental.pallas import tpu as pltpu

# Scoped-VMEM budget: above the v5e/v6e defaults (16/32 MiB) but with headroom
# below v7x's 64 MiB physical VMEM.
_VMEM_LIMIT = 48 * 1024 * 1024


# ------------------------------ tiling helper -------------------------------

def _tile(dim, desired, align):
    """Largest multiple of `align` that divides `dim` and is <= `desired`.
    Falls back to the full dim (a full-extent block is always legal)."""
    if dim <= desired:
        return dim
    t = (desired // align) * align
    while t >= align:
        if dim % t == 0:
            return t
        t -= align
    return dim


# ----------------------------- Pallas kernels ------------------------------

def _dense_kernel(x_ref, w_ref, b_ref, o_ref, *, activation):
    # Weight block is VMEM-resident (full K,N) -> single reduction step,
    # no accumulator scratch needed.
    y = jnp.dot(x_ref[...], w_ref[...], preferred_element_type=jnp.float32)
    y = y + b_ref[...]
    if activation == "gelu":
        # tanh-approx GELU; BERT's exact-erf gelu differs only slightly.
        # TODO(synk): exact erf GELU if strict parity with HF BERT is needed.
        c = 0.7978845608028654  # sqrt(2/pi)
        y = 0.5 * y * (1.0 + jnp.tanh(c * (y + 0.044715 * y * y * y)))
    o_ref[...] = y.astype(o_ref.dtype)


def dense(x, w, b, activation=None, tm=512):
    """out = act(x @ w + b).  x/w bf16, f32 accumulate, bf16 out.
    Weight fully VMEM-resident; grid only over M rows.
    TODO(synk): re-introduce a K/N-tiled accumulator path for weights that do
    not fit VMEM (not needed at BERT sizes: 768x3072 bf16 ~ 4.5 MiB)."""
    M, K = x.shape
    N = w.shape[1]
    tm = _tile(M, tm, 16)   # 16-row alignment for bf16 sublane packing
    return pl.pallas_call(
        functools.partial(_dense_kernel, activation=activation),
        out_shape=jax.ShapeDtypeStruct((M, N), jnp.bfloat16),
        grid=(M // tm,),
        in_specs=[
            pl.BlockSpec((tm, K), lambda i: (i, 0)),
            pl.BlockSpec((K, N), lambda i: (0, 0)),   # resident: block reused
            pl.BlockSpec((1, N), lambda i: (0, 0)),
        ],
        out_specs=pl.BlockSpec((tm, N), lambda i: (i, 0)),
        compiler_params=pltpu.CompilerParams(
            dimension_semantics=("parallel",),
            vmem_limit_bytes=_VMEM_LIMIT),
    )(x, w, b.reshape(1, N))


def _dense_add_ln_kernel(x_ref, w_ref, b_ref, r_ref, g_ref, bb_ref, o_ref, *, eps):
    y = jnp.dot(x_ref[...], w_ref[...], preferred_element_type=jnp.float32)
    # Epilogue: bias + residual + LayerNorm (reductions ride the XLU slot).
    y = y + b_ref[...] + r_ref[...].astype(jnp.float32)
    mu = jnp.mean(y, axis=-1, keepdims=True)
    yc = y - mu
    var = jnp.mean(yc * yc, axis=-1, keepdims=True)
    o_ref[...] = (yc * lax.rsqrt(var + eps) * g_ref[...]
                  + bb_ref[...]).astype(o_ref.dtype)


def dense_add_ln(x, w, b, residual, gamma, beta, eps=1e-12, tm=512):
    """out = LayerNorm(x @ w + b + residual).  Full-N blocks (needed for LN),
    weight VMEM-resident, bf16 in/out, f32 math."""
    M, K = x.shape
    N = w.shape[1]
    tm = _tile(M, tm, 16)
    return pl.pallas_call(
        functools.partial(_dense_add_ln_kernel, eps=eps),
        out_shape=jax.ShapeDtypeStruct((M, N), jnp.bfloat16),
        grid=(M // tm,),
        in_specs=[
            pl.BlockSpec((tm, K), lambda i: (i, 0)),
            pl.BlockSpec((K, N), lambda i: (0, 0)),   # resident weight
            pl.BlockSpec((1, N), lambda i: (0, 0)),
            pl.BlockSpec((tm, N), lambda i: (i, 0)),
            pl.BlockSpec((1, N), lambda i: (0, 0)),
            pl.BlockSpec((1, N), lambda i: (0, 0)),
        ],
        out_specs=pl.BlockSpec((tm, N), lambda i: (i, 0)),
        compiler_params=pltpu.CompilerParams(
            dimension_semantics=("parallel",),
            vmem_limit_bytes=_VMEM_LIMIT),
    )(x, w, b.reshape(1, N), residual, gamma.reshape(1, N), beta.reshape(1, N))


def _layernorm_kernel(x_ref, g_ref, b_ref, o_ref, *, eps):
    x = x_ref[...].astype(jnp.float32)
    mu = jnp.mean(x, axis=-1, keepdims=True)
    xc = x - mu
    var = jnp.mean(xc * xc, axis=-1, keepdims=True)
    o_ref[...] = (xc * lax.rsqrt(var + eps) * g_ref[...] + b_ref[...]).astype(o_ref.dtype)


def layernorm(x, g, b, eps=1e-12, tm=512):
    M, H = x.shape
    tm = _tile(M, tm, 16)
    return pl.pallas_call(
        functools.partial(_layernorm_kernel, eps=eps),
        out_shape=jax.ShapeDtypeStruct((M, H), jnp.bfloat16),
        grid=(M // tm,),
        in_specs=[
            pl.BlockSpec((tm, H), lambda i: (i, 0)),
            pl.BlockSpec((1, H), lambda i: (0, 0)),
            pl.BlockSpec((1, H), lambda i: (0, 0)),
        ],
        out_specs=pl.BlockSpec((tm, H), lambda i: (i, 0)),
        compiler_params=pltpu.CompilerParams(
            dimension_semantics=("parallel",),
            vmem_limit_bytes=_VMEM_LIMIT),
    )(x, g.reshape(1, H), b.reshape(1, H))


def _attention_kernel(qkv_ref, m_ref, o_ref, *, num_heads, head_dim, scale):
    # qkv tile: (S, 3H) bf16, H = num_heads * head_dim, lanes fully dense.
    qkv = qkv_ref[...]
    add_mask = m_ref[...]                       # (1, S) f32 additive mask
    H = num_heads * head_dim
    for h in range(num_heads):                  # static unrolled head loop
        lo = h * head_dim
        hi = lo + head_dim
        # Fold 1/sqrt(D) into q: S*D multiplies instead of S*S on the scores.
        q = qkv[:, lo:hi] * scale
        k = qkv[:, H + lo:H + hi]
        v = qkv[:, 2 * H + lo:2 * H + hi]
        s = lax.dot_general(q, k, (((1,), (1,)), ((), ())),
                            preferred_element_type=jnp.float32) + add_mask
        s = s - jnp.max(s, axis=-1, keepdims=True)
        p = jnp.exp(s)
        p = p * pl.reciprocal(jnp.sum(p, axis=-1, keepdims=True), approx=True)
        # Stream each head's result straight into the output slab: bounds the
        # live range and removes the final concatenate relayout.
        o_ref[:, lo:hi] = jnp.dot(p.astype(jnp.bfloat16), v,
                                  preferred_element_type=jnp.float32
                                  ).astype(o_ref.dtype)
    # TODO(synk): for head_dim=64 production shapes, permute w_qkv to a
    #             head-major layout (128-aligned head pairs) to avoid lane-shift
    #             relayouts, and add a q-tile/flash KV grid axis for long S.


def attention(qkv3d, add_mask, *, num_heads, head_dim, scale):
    B, S, threeH = qkv3d.shape
    H = threeH // 3
    return pl.pallas_call(
        functools.partial(_attention_kernel, num_heads=num_heads,
                          head_dim=head_dim, scale=scale),
        out_shape=jax.ShapeDtypeStruct((B, S, H), jnp.bfloat16),
        grid=(B,),
        in_specs=[
            pl.BlockSpec((None, S, threeH), lambda b: (b, 0, 0)),
            pl.BlockSpec((None, 1, S), lambda b: (b, 0, 0)),   # no head broadcast
        ],
        out_specs=pl.BlockSpec((None, S, H), lambda b: (b, 0, 0)),
        compiler_params=pltpu.CompilerParams(
            dimension_semantics=("parallel",),
            vmem_limit_bytes=_VMEM_LIMIT),
    )(qkv3d, add_mask)


# ---------------- pointer head (+ mask) fused with CrossEntropy -------------

def _pointer_logits(h, w, pm):
    # h: (tr, L, H) bf16, w: (1, H) f32, pm: (tr, L) f32
    logits = jnp.sum(h.astype(jnp.float32) * w[jnp.newaxis, :, :], axis=-1)
    big = float(jnp.finfo(jnp.float32).max)     # matches torch.finfo(f32).max
    return logits * pm - (1.0 - pm) * big


def _pointer_kernel(h_ref, w_ref, pm_ref, logits_ref):
    logits_ref[...] = _pointer_logits(h_ref[...], w_ref[...],
                                      pm_ref[...]).astype(logits_ref.dtype)


def _pointer_ce_kernel(h_ref, w_ref, pm_ref, lab_ref, logits_ref, loss_ref):
    logits = _pointer_logits(h_ref[...], w_ref[...], pm_ref[...])   # (tr, L)
    logits_ref[...] = logits.astype(logits_ref.dtype)
    R, L = logits.shape
    m = jnp.max(logits, axis=-1, keepdims=True)
    lse = jnp.log(jnp.sum(jnp.exp(logits - m), axis=-1, keepdims=True)) + m
    labels = lab_ref[...]                                           # (tr, 1)
    col = lax.broadcasted_iota(jnp.int32, (R, L), 1)
    picked = jnp.sum(jnp.where(col == labels, logits, 0.0),
                     axis=-1, keepdims=True)
    loss_ref[...] = (lse - picked).astype(loss_ref.dtype)           # per-row NLL


def pointer_head(last_hidden, w_dot, pointer_mask, num_labels, labels=None, tr=512):
    B, S, H = last_hidden.shape
    M = B * S
    R = M // num_labels
    tr = _tile(R, tr, 8)                         # tile over rows -> pipelined DMA
    nblocks = R // tr
    h3 = last_hidden.reshape(R, num_labels, H)
    pm = pointer_mask.astype(jnp.float32).reshape(R, num_labels)
    w2 = w_dot.reshape(1, H).astype(jnp.float32)
    cp = pltpu.CompilerParams(dimension_semantics=("parallel",),
                              vmem_limit_bytes=_VMEM_LIMIT)
    if labels is None:
        logits = pl.pallas_call(
            _pointer_kernel,
            out_shape=jax.ShapeDtypeStruct((R, num_labels), jnp.float32),
            grid=(nblocks,),
            in_specs=[
                pl.BlockSpec((tr, num_labels, H), lambda i: (i, 0, 0)),
                pl.BlockSpec((1, H), lambda i: (0, 0)),
                pl.BlockSpec((tr, num_labels), lambda i: (i, 0)),
            ],
            out_specs=pl.BlockSpec((tr, num_labels), lambda i: (i, 0)),
            compiler_params=cp,
        )(h3, w2, pm)
        return logits, None
    lab = labels.reshape(R, 1).astype(jnp.int32)
    logits, loss_rows = pl.pallas_call(
        _pointer_ce_kernel,
        out_shape=(jax.ShapeDtypeStruct((R, num_labels), jnp.float32),
                   jax.ShapeDtypeStruct((R, 1), jnp.float32)),
        grid=(nblocks,),
        in_specs=[
            pl.BlockSpec((tr, num_labels, H), lambda i: (i, 0, 0)),
            pl.BlockSpec((1, H), lambda i: (0, 0)),
            pl.BlockSpec((tr, num_labels), lambda i: (i, 0)),
            pl.BlockSpec((tr, 1), lambda i: (i, 0)),
        ],
        out_specs=(pl.BlockSpec((tr, num_labels), lambda i: (i, 0)),
                   pl.BlockSpec((tr, 1), lambda i: (i, 0))),
        compiler_params=cp,
    )(h3, w2, pm, lab)
    loss = jnp.sum(loss_rows) / R                # finish the CE mean in JAX
    return logits, loss


# ----------------------------- Model glue (plain JAX) ----------------------

def init_params(key, cfg):
    H, I = cfg["hidden"], cfg["intermediate"]

    def nxt():
        nonlocal key
        key, sub = jax.random.split(key)
        return sub

    def w(shape):
        return jax.random.normal(nxt(), shape, jnp.float32) * 0.02

    def wbf(shape):                       # weights pre-cast to bf16 once
        return w(shape).astype(jnp.bfloat16)

    params = {
        "word_emb": w((cfg["vocab"], H)),
        "pos_emb": w((cfg["max_pos"], H)),
        "type_emb": w((cfg["type_vocab"], H)),
        "emb_ln_g": jnp.ones((H,), jnp.float32),
        "emb_ln_b": jnp.zeros((H,), jnp.float32),
        "w_dot": w((H,)),   # nn.Linear(hidden, 1, bias=False).weight, stored flat
        "layers": [],
    }
    for _ in range(cfg["layers"]):
        params["layers"].append({
            # Q/K/V projections fused into one (H, 3H) bf16 weight: [q | k | v].
            "w_qkv": wbf((H, 3 * H)), "b_qkv": jnp.zeros((3 * H,), jnp.float32),
            "wo": wbf((H, H)), "bo": jnp.zeros((H,), jnp.float32),
            "ln1_g": jnp.ones((H,), jnp.float32), "ln1_b": jnp.zeros((H,), jnp.float32),
            "w1": wbf((H, I)), "b1": jnp.zeros((I,), jnp.float32),
            "w2": wbf((I, H)), "b2": jnp.zeros((H,), jnp.float32),
            "ln2_g": jnp.ones((H,), jnp.float32), "ln2_b": jnp.zeros((H,), jnp.float32),
        })
    return params


def bert_encoder(params, input_ids, token_type_ids, attention_mask, position_ids, cfg):
    B, S = input_ids.shape
    H, nH, D = cfg["hidden"], cfg["heads"], cfg["head_dim"]
    M = B * S

    # Embedding lookups kept as plain-JAX glue (gather); LayerNorm in a kernel.
    emb = (params["word_emb"][input_ids]
           + params["pos_emb"][position_ids]
           + params["type_emb"][token_type_ids])
    x = layernorm(emb.reshape(M, H), params["emb_ln_g"], params["emb_ln_b"])  # bf16

    # BERT-style additive attention mask, kept at (B, 1, S) — no head broadcast.
    add_mask = ((1.0 - attention_mask.astype(jnp.float32)) * -10000.0).reshape(B, 1, S)
    scale = 1.0 / math.sqrt(D)

    for layer in params["layers"]:
        # Fused QKV projection: one resident-weight matmul reads x once.
        qkv = dense(x, layer["w_qkv"], layer["b_qkv"])            # (M, 3H) bf16
        ctx = attention(qkv.reshape(B, S, 3 * H), add_mask,
                        num_heads=nH, head_dim=D, scale=scale)    # (B, S, H) bf16
        # Output projection fused with residual-add + LayerNorm.
        x = dense_add_ln(ctx.reshape(M, H), layer["wo"], layer["bo"],
                         x, layer["ln1_g"], layer["ln1_b"])
        # FFN: GELU fused in the first matmul epilogue; second matmul fused
        # with residual-add + LayerNorm.
        ffn = dense(x, layer["w1"], layer["b1"], activation="gelu")
        x = dense_add_ln(ffn, layer["w2"], layer["b2"],
                         x, layer["ln2_g"], layer["ln2_b"])

    return x.reshape(B, S, H)   # last_hidden_state (bf16)


def pointer_bert_forward(params, input_ids, token_type_ids=None, attention_mask=None,
                         labels=None, position_ids=None, head_mask=None,
                         pointer_mask=None, cfg=None):
    B, S = input_ids.shape
    num_labels = cfg["max_token_len"]
    assert (B * S) % num_labels == 0

    if token_type_ids is None:
        token_type_ids = jnp.zeros((B, S), jnp.int32)
    if attention_mask is None:
        attention_mask = jnp.ones((B, S), jnp.float32)
    if position_ids is None:
        position_ids = jnp.broadcast_to(jnp.arange(S, dtype=jnp.int32), (B, S))
    # TODO(synk): head_mask is ignored (None in the reference use-case).

    last_hidden = bert_encoder(params, input_ids, token_type_ids,
                               attention_mask, position_ids, cfg)

    # self.dropout: inference (eval) mode -> identity.
    # TODO(synk): training-mode dropout (bernoulli mask via pltpu.prng_*) omitted.

    if pointer_mask is None:
        pointer_mask = jnp.ones((B, S), jnp.float32)  # identity under the mask formula

    logits, loss = pointer_head(last_hidden, params["w_dot"],
                                pointer_mask, num_labels, labels)

    # bert outputs[2:] (hidden_states / attentions) are not produced here.
    if labels is not None:
        return loss, logits
    return (logits,)


# ----------------------------------- main -----------------------------------

if __name__ == "__main__":
    cfg = dict(vocab=50, hidden=32, heads=2, head_dim=16, intermediate=64,
               layers=2, max_pos=16, type_vocab=2, max_token_len=8)
    B, S = 2, 8

    key = jax.random.PRNGKey(0)
    pkey, ikey, lkey = jax.random.split(key, 3)
    params = init_params(pkey, cfg)

    input_ids = jax.random.randint(ikey, (B, S), 0, cfg["vocab"], dtype=jnp.int32)
    token_type_ids = jnp.zeros((B, S), jnp.int32)
    attention_mask = jnp.ones((B, S), jnp.float32)
    pointer_mask = jnp.ones((B, S), jnp.float32).at[:, -1].set(0.0)
    labels = jax.random.randint(lkey, (B,), 0, S - 1, dtype=jnp.int32)

    fwd = jax.jit(functools.partial(pointer_bert_forward, cfg=cfg))
    loss, logits = fwd(params, input_ids,
                       token_type_ids=token_type_ids,
                       attention_mask=attention_mask,
                       labels=labels,
                       pointer_mask=pointer_mask)
    jax.block_until_ready((loss, logits))
    assert logits.shape == (B, cfg["max_token_len"])
    assert bool(jnp.isfinite(loss))
    print("KERNEL_OK")
</pallas_src>

<mosaic_0001>
module attributes {stable_mosaic.version = 11 : i64} {
  func.func @_layernorm_kernel(%arg0: i32, %arg1: memref<16x32xf32, #tpu.memory_space<vmem>>, %arg2: memref<1x32xf32, #tpu.memory_space<vmem>>, %arg3: memref<1x32xf32, #tpu.memory_space<vmem>>, %arg4: memref<16x32xbf16, #tpu.memory_space<vmem>>) attributes {dimension_semantics = [#tpu.dimension_semantics<parallel>], iteration_bounds = array<i64: 1>, scalar_prefetch = 0 : i64, scratch_operands = 0 : i64, tpu.core_type = #tpu.core_type<tc>, window_params = [{transform_indices = @transform_0, window_bounds = array<i64: 16, 32>}, {pipeline_mode = #tpu.pipeline_mode<synchronous>, transform_indices = @transform_1, window_bounds = array<i64: 1, 32>}, {pipeline_mode = #tpu.pipeline_mode<synchronous>, transform_indices = @transform_2, window_bounds = array<i64: 1, 32>}, {transform_indices = @transform_3, window_bounds = array<i64: 16, 32>}]} {
    %c0 = arith.constant 0 : index
    %c0_0 = arith.constant 0 : index
    %0 = vector.load %arg1[%c0, %c0_0] : memref<16x32xf32, #tpu.memory_space<vmem>>, vector<16x32xf32>
    %cst = arith.constant dense<0.000000e+00> : vector<16xf32>
    %1 = vector.multi_reduction <add>, %0, %cst [1] : vector<16x32xf32> to vector<16xf32>
    %2 = vector.shape_cast %1 : vector<16xf32> to vector<16x1xf32>
    %cst_1 = arith.constant 3.200000e+01 : f32
    %3 = vector.broadcast %cst_1 : f32 to vector<16x1xf32>
    %4 = arith.divf %2, %3 : vector<16x1xf32>
    %5 = vector.broadcast %4 : vector<16x1xf32> to vector<16x32xf32>
    %6 = arith.subf %0, %5 : vector<16x32xf32>
    %7 = arith.mulf %6, %6 : vector<16x32xf32>
    %cst_2 = arith.constant dense<0.000000e+00> : vector<16xf32>
    %8 = vector.multi_reduction <add>, %7, %cst_2 [1] : vector<16x32xf32> to vector<16xf32>
    %9 = vector.shape_cast %8 : vector<16xf32> to vector<16x1xf32>
    %cst_3 = arith.constant 3.200000e+01 : f32
    %10 = vector.broadcast %cst_3 : f32 to vector<16x1xf32>
    %11 = arith.divf %9, %10 : vector<16x1xf32>
    %cst_4 = arith.constant 9.99999996E-13 : f32
    %12 = vector.broadcast %cst_4 : f32 to vector<16x1xf32>
    %13 = arith.addf %11, %12 : vector<16x1xf32>
    %14 = math.rsqrt %13 : vector<16x1xf32>
    %15 = vector.broadcast %14 : vector<16x1xf32> to vector<16x32xf32>
    %16 = arith.mulf %6, %15 : vector<16x32xf32>
    %c0_5 = arith.constant 0 : index
    %c0_6 = arith.constant 0 : index
    %17 = vector.load %arg2[%c0_5, %c0_6] : memref<1x32xf32, #tpu.memory_space<vmem>>, vector<1x32xf32>
    %18 = vector.broadcast %17 : vector<1x32xf32> to vector<16x32xf32>
    %19 = arith.mulf %16, %18 : vector<16x32xf32>
    %c0_7 = arith.constant 0 : index
    %c0_8 = arith.constant 0 : index
    %20 = vector.load %arg3[%c0_7, %c0_8] : memref<1x32xf32, #tpu.memory_space<vmem>>, vector<1x32xf32>
    %21 = vector.broadcast %20 : vector<1x32xf32> to vector<16x32xf32>
    %22 = arith.addf %19, %21 : vector<16x32xf32>
    %23 = arith.truncf %22 : vector<16x32xf32> to vector<16x32xbf16>
    %c0_9 = arith.constant 0 : index
    %c0_10 = arith.constant 0 : index
    %24 = vector.load %arg4[%c0_9, %c0_10] : memref<16x32xbf16, #tpu.memory_space<vmem>>, vector<16x32xbf16>
    tpu.vector_store %arg4[%c0_9, %c0_10], %23 {strides = array<i32>} : memref<16x32xbf16, #tpu.memory_space<vmem>>, vector<16x32xbf16>,
    return
  }
  func.func @transform_0(%arg0: i32) -> (i32, i32) {
    %c0_i32 = arith.constant 0 : i32
    %c0_i32_0 = arith.constant 0 : i32
    return %arg0, %c0_i32 : i32, i32
  }
  func.func @transform_1(%arg0: i32) -> (i32, i32) {
    %c0_i32 = arith.constant 0 : i32
    %c0_i32_0 = arith.constant 0 : i32
    %c0_i32_1 = arith.constant 0 : i32
    return %c0_i32, %c0_i32_0 : i32, i32
  }
  func.func @transform_2(%arg0: i32) -> (i32, i32) {
    %c0_i32 = arith.constant 0 : i32
    %c0_i32_0 = arith.constant 0 : i32
    %c0_i32_1 = arith.constant 0 : i32
    return %c0_i32, %c0_i32_0 : i32, i32
  }
  func.func @transform_3(%arg0: i32) -> (i32, i32) {
    %c0_i32 = arith.constant 0 : i32
    %c0_i32_0 = arith.constant 0 : i32
    return %arg0, %c0_i32 : i32, i32
  }
}

module attributes {stable_mosaic.version = 11 : i64} {
  func.func @_attention_kernel(%arg0: i32, %arg1: memref<1x8x96xbf16, #tpu.memory_space<vmem>>, %arg2: memref<1x1x8xf32, #tpu.memory_space<vmem>>, %arg3: memref<1x8x32xbf16, #tpu.memory_space<vmem>>) attributes {dimension_semantics = [#tpu.dimension_semantics<parallel>], iteration_bounds = array<i64: 2>, scalar_prefetch = 0 : i64, scratch_operands = 0 : i64, tpu.core_type = #tpu.core_type<tc>, window_params = [{transform_indices = @transform_0, window_bounds = array<i64: 1, 8, 96>}, {transform_indices = @transform_1, window_bounds = array<i64: 1, 1, 8>}, {transform_indices = @transform_2, window_bounds = array<i64: 1, 8, 32>}]} {
    %c0 = arith.constant 0 : index
    %c0_0 = arith.constant 0 : index
    %c0_1 = arith.constant 0 : index
    %0 = vector.load %arg1[%c0, %c0_0, %c0_1] : memref<1x8x96xbf16, #tpu.memory_space<vmem>>, vector<1x8x96xbf16>
    %1 = vector.shape_cast %0 : vector<1x8x96xbf16> to vector<8x96xbf16>
    %c0_2 = arith.constant 0 : index
    %c0_3 = arith.constant 0 : index
    %c0_4 = arith.constant 0 : index
    %2 = vector.load %arg2[%c0_2, %c0_3, %c0_4] : memref<1x1x8xf32, #tpu.memory_space<vmem>>, vector<1x1x8xf32>
    %3 = vector.shape_cast %2 : vector<1x1x8xf32> to vector<1x8xf32>
    %4 = vector.extract_strided_slice %1 {offsets = [0, 0], sizes = [8, 16], strides = [1, 1]} : vector<8x96xbf16> to vector<8x16xbf16>
    %cst = arith.constant 2.500000e-01 : bf16
    %5 = vector.broadcast %cst : bf16 to vector<8x16xbf16>
    %6 = arith.mulf %4, %5 : vector<8x16xbf16>
    %7 = vector.extract_strided_slice %1 {offsets = [0, 32], sizes = [8, 16], strides = [1, 1]} : vector<8x96xbf16> to vector<8x16xbf16>
    %8 = vector.extract_strided_slice %1 {offsets = [0, 64], sizes = [8, 16], strides = [1, 1]} : vector<8x96xbf16> to vector<8x16xbf16>
    %cst_5 = arith.constant dense<0.000000e+00> : vector<8x8xf32>
    %9 = tpu.matmul %6, %7, %cst_5 {dimension_numbers = #tpu.dot_dimension_numbers<[1], [1], [0], [0], [0, 0, 1, 0], [], []>} : vector<8x16xbf16>, vector<8x16xbf16>, vector<8x8xf32> -> vector<8x8xf32>
    %10 = vector.broadcast %3 : vector<1x8xf32> to vector<8x8xf32>
    %11 = arith.addf %9, %10 : vector<8x8xf32>
    %cst_6 = arith.constant dense<0xFF800000> : vector<8xf32>
    %12 = vector.multi_reduction <maximumf>, %11, %cst_6 [1] : vector<8x8xf32> to vector<8xf32>
    %13 = vector.shape_cast %12 : vector<8xf32> to vector<8x1xf32>
    %14 = vector.broadcast %13 : vector<8x1xf32> to vector<8x8xf32>
    %15 = arith.subf %11, %14 : vector<8x8xf32>
    %16 = math.exp %15 : vector<8x8xf32>
    %cst_7 = arith.constant dense<0.000000e+00> : vector<8xf32>
    %17 = vector.multi_reduction <add>, %16, %cst_7 [1] : vector<8x8xf32> to vector<8xf32>
    %18 = vector.shape_cast %17 : vector<8xf32> to vector<8x1xf32>
    %19 = tpu.reciprocal %18 {approx = true} : vector<8x1xf32> -> vector<8x1xf32>
    %20 = vector.broadcast %19 : vector<8x1xf32> to vector<8x8xf32>
    %21 = arith.mulf %16, %20 : vector<8x8xf32>
    %22 = arith.truncf %21 : vector<8x8xf32> to vector<8x8xbf16>
    %cst_8 = arith.constant dense<0.000000e+00> : vector<8x16xf32>
    %23 = tpu.matmul %22, %8, %cst_8 {dimension_numbers = #tpu.dot_dimension_numbers<[1], [0], [0], [1], [0, 0, 1, 1], [], []>} : vector<8x8xbf16>, vector<8x16xbf16>, vector<8x16xf32> -> vector<8x16xf32>
    %24 = arith.truncf %23 : vector<8x16xf32> to vector<8x16xbf16>
    %c0_9 = arith.constant 0 : index
    %c0_10 = arith.constant 0 : index
    %c0_11 = arith.constant 0 : index
    %25 = vector.load %arg3[%c0_9, %c0_10, %c0_11] : memref<1x8x32xbf16, #tpu.memory_space<vmem>>, vector<1x8x16xbf16>
    %26 = vector.shape_cast %25 : vector<1x8x16xbf16> to vector<8x16xbf16>
    %27 = vector.shape_cast %24 : vector<8x16xbf16> to vector<1x8x16xbf16>
    tpu.vector_store %arg3[%c0_9, %c0_10, %c0_11], %27 {strides = array<i32>} : memref<1x8x32xbf16, #tpu.memory_space<vmem>>, vector<1x8x16xbf16>,
    %28 = vector.extract_strided_slice %1 {offsets = [0, 16], sizes = [8, 16], strides = [1, 1]} : vector<8x96xbf16> to vector<8x16xbf16>
    %cst_12 = arith.constant 2.500000e-01 : bf16
    %29 = vector.broadcast %cst_12 : bf16 to vector<8x16xbf16>
    %30 = arith.mulf %28, %29 : vector<8x16xbf16>
    %31 = vector.extract_strided_slice %1 {offsets = [0, 48], sizes = [8, 16], strides = [1, 1]} : vector<8x96xbf16> to vector<8x16xbf16>
    %32 = vector.extract_strided_slice %1 {offsets = [0, 80], sizes = [8, 16], strides = [1, 1]} : vector<8x96xbf16> to vector<8x16xbf16>
    %cst_13 = arith.constant dense<0.000000e+00> : vector<8x8xf32>
    %33 = tpu.matmul %30, %31, %cst_13 {dimension_numbers = #tpu.dot_dimension_numbers<[1], [1], [0], [0], [0, 0, 1, 0], [], []>} : vector<8x16xbf16>, vector<8x16xbf16>, vector<8x8xf32> -> vector<8x8xf32>
    %34 = vector.broadcast %3 : vector<1x8xf32> to vector<8x8xf32>
    %35 = arith.addf %33, %34 : vector<8x8xf32>
    %cst_14 = arith.constant dense<0xFF800000> : vector<8xf32>
    %36 = vector.multi_reduction <maximumf>, %35, %cst_14 [1] : vector<8x8xf32> to vector<8xf32>
    %37 = vector.shape_cast %36 : vector<8xf32> to vector<8x1xf32>
    %38 = vector.broadcast %37 : vector<8x1xf32> to vector<8x8xf32>
    %39 = arith.subf %35, %38 : vector<8x8xf32>
    %40 = math.exp %39 : vector<8x8xf32>
    %cst_15 = arith.constant dense<0.000000e+00> : vector<8xf32>
    %41 = vector.multi_reduction <add>, %40, %cst_15 [1] : vector<8x8xf32> to vector<8xf32>
    %42 = vector.shape_cast %41 : vector<8xf32> to vector<8x1xf32>
    %43 = tpu.reciprocal %42 {approx = true} : vector<8x1xf32> -> vector<8x1xf32>
    %44 = vector.broadcast %43 : vector<8x1xf32> to vector<8x8xf32>
    %45 = arith.mulf %40, %44 : vector<8x8xf32>
    %46 = arith.truncf %45 : vector<8x8xf32> to vector<8x8xbf16>
    %cst_16 = arith.constant dense<0.000000e+00> : vector<8x16xf32>
    %47 = tpu.matmul %46, %32, %cst_16 {dimension_numbers = #tpu.dot_dimension_numbers<[1], [0], [0], [1], [0, 0, 1, 1], [], []>} : vector<8x8xbf16>, vector<8x16xbf16>, vector<8x16xf32> -> vector<8x16xf32>
    %48 = arith.truncf %47 : vector<8x16xf32> to vector<8x16xbf16>
    %c0_17 = arith.constant 0 : index
    %c0_18 = arith.constant 0 : index
    %c16 = arith.constant 16 : index
    %49 = vector.load %arg3[%c0_17, %c0_18, %c16] : memref<1x8x32xbf16, #tpu.memory_space<vmem>>, vector<1x8x16xbf16>
    %50 = vector.shape_cast %49 : vector<1x8x16xbf16> to vector<8x16xbf16>
    %51 = vector.shape_cast %48 : vector<8x16xbf16> to vector<1x8x16xbf16>
    tpu.vector_store %arg3[%c0_17, %c0_18, %c16], %51 {strides = array<i32>} : memref<1x8x32xbf16, #tpu.memory_space<vmem>>, vector<1x8x16xbf16>,
    return
  }
  func.func @transform_0(%arg0: i32) -> (i32, i32, i32) {
    %c0_i32 = arith.constant 0 : i32
    %c0_i32_0 = arith.constant 0 : i32
    %c0_i32_1 = arith.constant 0 : i32
    return %arg0, %c0_i32, %c0_i32_0 : i32, i32, i32
  }
  func.func @transform_1(%arg0: i32) -> (i32, i32, i32) {
    %c0_i32 = arith.constant 0 : i32
    %c0_i32_0 = arith.constant 0 : i32
    %c0_i32_1 = arith.constant 0 : i32
    return %arg0, %c0_i32, %c0_i32_0 : i32, i32, i32
  }
  func.func @transform_2(%arg0: i32) -> (i32, i32, i32) {
    %c0_i32 = arith.constant 0 : i32
    %c0_i32_0 = arith.constant 0 : i32
    %c0_i32_1 = arith.constant 0 : i32
    return %arg0, %c0_i32, %c0_i32_0 : i32, i32, i32
  }
}

module attributes {stable_mosaic.version = 11 : i64} {
  func.func @_dense_kernel(%arg0: i32, %arg1: memref<16x32xbf16, #tpu.memory_space<vmem>>, %arg2: memref<32x96xbf16, #tpu.memory_space<vmem>>, %arg3: memref<1x96xf32, #tpu.memory_space<vmem>>, %arg4: memref<16x96xbf16, #tpu.memory_space<vmem>>) attributes {dimension_semantics = [#tpu.dimension_semantics<parallel>], iteration_bounds = array<i64: 1>, scalar_prefetch = 0 : i64, scratch_operands = 0 : i64, tpu.core_type = #tpu.core_type<tc>, window_params = [{transform_indices = @transform_0, window_bounds = array<i64: 16, 32>}, {pipeline_mode = #tpu.pipeline_mode<synchronous>, transform_indices = @transform_1, window_bounds = array<i64: 32, 96>}, {pipeline_mode = #tpu.pipeline_mode<synchronous>, transform_indices = @transform_2, window_bounds = array<i64: 1, 96>}, {transform_indices = @transform_3, window_bounds = array<i64: 16, 96>}]} {
    %c0 = arith.constant 0 : index
    %c0_0 = arith.constant 0 : index
    %0 = vector.load %arg1[%c0, %c0_0] : memref<16x32xbf16, #tpu.memory_space<vmem>>, vector<16x32xbf16>
    %c0_1 = arith.constant 0 : index
    %c0_2 = arith.constant 0 : index
    %1 = vector.load %arg2[%c0_1, %c0_2] : memref<32x96xbf16, #tpu.memory_space<vmem>>, vector<32x96xbf16>
    %cst = arith.constant dense<0.000000e+00> : vector<16x96xf32>
    %2 = tpu.matmul %0, %1, %cst {dimension_numbers = #tpu.dot_dimension_numbers<[1], [0], [0], [1], [0, 0, 1, 1], [], []>} : vector<16x32xbf16>, vector<32x96xbf16>, vector<16x96xf32> -> vector<16x96xf32>
    %c0_3 = arith.constant 0 : index
    %c0_4 = arith.constant 0 : index
    %3 = vector.load %arg3[%c0_3, %c0_4] : memref<1x96xf32, #tpu.memory_space<vmem>>, vector<1x96xf32>
    %4 = vector.broadcast %3 : vector<1x96xf32> to vector<16x96xf32>
    %5 = arith.addf %2, %4 : vector<16x96xf32>
    %6 = arith.truncf %5 : vector<16x96xf32> to vector<16x96xbf16>
    %c0_5 = arith.constant 0 : index
    %c0_6 = arith.constant 0 : index
    %7 = vector.load %arg4[%c0_5, %c0_6] : memref<16x96xbf16, #tpu.memory_space<vmem>>, vector<16x96xbf16>
    tpu.vector_store %arg4[%c0_5, %c0_6], %6 {strides = array<i32>} : memref<16x96xbf16, #tpu.memory_space<vmem>>, vector<16x96xbf16>,
    return
  }
  func.func @transform_0(%arg0: i32) -> (i32, i32) {
    %c0_i32 = arith.constant 0 : i32
    %c0_i32_0 = arith.constant 0 : i32
    return %arg0, %c0_i32 : i32, i32
  }
  func.func @transform_1(%arg0: i32) -> (i32, i32) {
    %c0_i32 = arith.constant 0 : i32
    %c0_i32_0 = arith.constant 0 : i32
    %c0_i32_1 = arith.constant 0 : i32
    return %c0_i32, %c0_i32_0 : i32, i32
  }
  func.func @transform_2(%arg0: i32) -> (i32, i32) {
    %c0_i32 = arith.constant 0 : i32
    %c0_i32_0 = arith.constant 0 : i32
    %c0_i32_1 = arith.constant 0 : i32
    return %c0_i32, %c0_i32_0 : i32, i32
  }
  func.func @transform_3(%arg0: i32) -> (i32, i32) {
    %c0_i32 = arith.constant 0 : i32
    %c0_i32_0 = arith.constant 0 : i32
    return %arg0, %c0_i32 : i32, i32
  }
}

module attributes {stable_mosaic.version = 11 : i64} {
  func.func @_dense_add_ln_kernel(%arg0: i32, %arg1: memref<16x32xbf16, #tpu.memory_space<vmem>>, %arg2: memref<32x32xbf16, #tpu.memory_space<vmem>>, %arg3: memref<1x32xf32, #tpu.memory_space<vmem>>, %arg4: memref<16x32xbf16, #tpu.memory_space<vmem>>, %arg5: memref<1x32xf32, #tpu.memory_space<vmem>>, %arg6: memref<1x32xf32, #tpu.memory_space<vmem>>, %arg7: memref<16x32xbf16, #tpu.memory_space<vmem>>) attributes {dimension_semantics = [#tpu.dimension_semantics<parallel>], iteration_bounds = array<i64: 1>, scalar_prefetch = 0 : i64, scratch_operands = 0 : i64, tpu.core_type = #tpu.core_type<tc>, window_params = [{transform_indices = @transform_0, window_bounds = array<i64: 16, 32>}, {pipeline_mode = #tpu.pipeline_mode<synchronous>, transform_indices = @transform_1, window_bounds = array<i64: 32, 32>}, {pipeline_mode = #tpu.pipeline_mode<synchronous>, transform_indices = @transform_2, window_bounds = array<i64: 1, 32>}, {transform_indices = @transform_3, window_bounds = array<i64: 16, 32>}, {pipeline_mode = #tpu.pipeline_mode<synchronous>, transform_indices = @transform_4, window_bounds = array<i64: 1, 32>}, {pipeline_mode = #tpu.pipeline_mode<synchronous>, transform_indices = @transform_5, window_bounds = array<i64: 1, 32>}, {transform_indices = @transform_6, window_bounds = array<i64: 16, 32>}]} {
    %c0 = arith.constant 0 : index
    %c0_0 = arith.constant 0 : index
    %0 = vector.load %arg1[%c0, %c0_0] : memref<16x32xbf16, #tpu.memory_space<vmem>>, vector<16x32xbf16>
    %c0_1 = arith.constant 0 : index
    %c0_2 = arith.constant 0 : index
    %1 = vector.load %arg2[%c0_1, %c0_2] : memref<32x32xbf16, #tpu.memory_space<vmem>>, vector<32x32xbf16>
    %cst = arith.constant dense<0.000000e+00> : vector<16x32xf32>
    %2 = tpu.matmul %0, %1, %cst {dimension_numbers = #tpu.dot_dimension_numbers<[1], [0], [0], [1], [0, 0, 1, 1], [], []>} : vector<16x32xbf16>, vector<32x32xbf16>, vector<16x32xf32> -> vector<16x32xf32>
    %c0_3 = arith.constant 0 : index
    %c0_4 = arith.constant 0 : index
    %3 = vector.load %arg3[%c0_3, %c0_4] : memref<1x32xf32, #tpu.memory_space<vmem>>, vector<1x32xf32>
    %4 = vector.broadcast %3 : vector<1x32xf32> to vector<16x32xf32>
    %5 = arith.addf %2, %4 : vector<16x32xf32>
    %c0_5 = arith.constant 0 : index
    %c0_6 = arith.constant 0 : index
    %6 = vector.load %arg4[%c0_5, %c0_6] : memref<16x32xbf16, #tpu.memory_space<vmem>>, vector<16x32xbf16>
    %7 = arith.extf %6 : vector<16x32xbf16> to vector<16x32xf32>
    %8 = arith.addf %5, %7 : vector<16x32xf32>
    %cst_7 = arith.constant dense<0.000000e+00> : vector<16xf32>
    %9 = vector.multi_reduction <add>, %8, %cst_7 [1] : vector<16x32xf32> to vector<16xf32>
    %10 = vector.shape_cast %9 : vector<16xf32> to vector<16x1xf32>
    %cst_8 = arith.constant 3.200000e+01 : f32
    %11 = vector.broadcast %cst_8 : f32 to vector<16x1xf32>
    %12 = arith.divf %10, %11 : vector<16x1xf32>
    %13 = vector.broadcast %12 : vector<16x1xf32> to vector<16x32xf32>
    %14 = arith.subf %8, %13 : vector<16x32xf32>
    %15 = arith.mulf %14, %14 : vector<16x32xf32>
    %cst_9 = arith.constant dense<0.000000e+00> : vector<16xf32>
    %16 = vector.multi_reduction <add>, %15, %cst_9 [1] : vector<16x32xf32> to vector<16xf32>
    %17 = vector.shape_cast %16 : vector<16xf32> to vector<16x1xf32>
    %cst_10 = arith.constant 3.200000e+01 : f32
    %18 = vector.broadcast %cst_10 : f32 to vector<16x1xf32>
    %19 = arith.divf %17, %18 : vector<16x1xf32>
    %cst_11 = arith.constant 9.99999996E-13 : f32
    %20 = vector.broadcast %cst_11 : f32 to vector<16x1xf32>
    %21 = arith.addf %19, %20 : vector<16x1xf32>
    %22 = math.rsqrt %21 : vector<16x1xf32>
    %23 = vector.broadcast %22 : vector<16x1xf32> to vector<16x32xf32>
    %24 = arith.mulf %14, %23 : vector<16x32xf32>
    %c0_12 = arith.constant 0 : index
    %c0_13 = arith.constant 0 : index
    %25 = vector.load %arg5[%c0_12, %c0_13] : memref<1x32xf32, #tpu.memory_space<vmem>>, vector<1x32xf32>
    %26 = vector.broadcast %25 : vector<1x32xf32> to vector<16x32xf32>
    %27 = arith.mulf %24, %26 : vector<16x32xf32>
    %c0_14 = arith.constant 0 : index
    %c0_15 = arith.constant 0 : index
    %28 = vector.load %arg6[%c0_14, %c0_15] : memref<1x32xf32, #tpu.memory_space<vmem>>, vector<1x32xf32>
    %29 = vector.broadcast %28 : vector<1x32xf32> to vector<16x32xf32>
    %30 = arith.addf %27, %29 : vector<16x32xf32>
    %31 = arith.truncf %30 : vector<16x32xf32> to vector<16x32xbf16>
    %c0_16 = arith.constant 0 : index
    %c0_17 = arith.constant 0 : index
    %32 = vector.load %arg7[%c0_16, %c0_17] : memref<16x32xbf16, #tpu.memory_space<vmem>>, vector<16x32xbf16>
    tpu.vector_store %arg7[%c0_16, %c0_17], %31 {strides = array<i32>} : memref<16x32xbf16, #tpu.memory_space<vmem>>, vector<16x32xbf16>,
    return
  }
  func.func @transform_0(%arg0: i32) -> (i32, i32) {
    %c0_i32 = arith.constant 0 : i32
    %c0_i32_0 = arith.constant 0 : i32
    return %arg0, %c0_i32 : i32, i32
  }
  func.func @transform_1(%arg0: i32) -> (i32, i32) {
    %c0_i32 = arith.constant 0 : i32
    %c0_i32_0 = arith.constant 0 : i32
    %c0_i32_1 = arith.constant 0 : i32
    return %c0_i32, %c0_i32_0 : i32, i32
  }
  func.func @transform_2(%arg0: i32) -> (i32, i32) {
    %c0_i32 = arith.constant 0 : i32
    %c0_i32_0 = arith.constant 0 : i32
    %c0_i32_1 = arith.constant 0 : i32
    return %c0_i32, %c0_i32_0 : i32, i32
  }
  func.func @transform_3(%arg0: i32) -> (i32, i32) {
    %c0_i32 = arith.constant 0 : i32
    %c0_i32_0 = arith.constant 0 : i32
    return %arg0, %c0_i32 : i32, i32
  }
  func.func @transform_4(%arg0: i32) -> (i32, i32) {
    %c0_i32 = arith.constant 0 : i32
    %c0_i32_0 = arith.constant 0 : i32
    %c0_i32_1 = arith.constant 0 : i32
    return %c0_i32, %c0_i32_0 : i32, i32
  }
  func.func @transform_5(%arg0: i32) -> (i32, i32) {
    %c0_i32 = arith.constant 0 : i32
    %c0_i32_0 = arith.constant 0 : i32
    %c0_i32_1 = arith.constant 0 : i32
    return %c0_i32, %c0_i32_0 : i32, i32
  }
  func.func @transform_6(%arg0: i32) -> (i32, i32) {
    %c0_i32 = arith.constant 0 : i32
    %c0_i32_0 = arith.constant 0 : i32
    return %arg0, %c0_i32 : i32, i32
  }
}

module attributes {stable_mosaic.version = 11 : i64} {
  func.func @_dense_add_ln_kernel(%arg0: i32, %arg1: memref<16x64xbf16, #tpu.memory_space<vmem>>, %arg2: memref<64x32xbf16, #tpu.memory_space<vmem>>, %arg3: memref<1x32xf32, #tpu.memory_space<vmem>>, %arg4: memref<16x32xbf16, #tpu.memory_space<vmem>>, %arg5: memref<1x32xf32, #tpu.memory_space<vmem>>, %arg6: memref<1x32xf32, #tpu.memory_space<vmem>>, %arg7: memref<16x32xbf16, #tpu.memory_space<vmem>>) attributes {dimension_semantics = [#tpu.dimension_semantics<parallel>], iteration_bounds = array<i64: 1>, scalar_prefetch = 0 : i64, scratch_operands = 0 : i64, tpu.core_type = #tpu.core_type<tc>, window_params = [{transform_indices = @transform_0, window_bounds = array<i64: 16, 64>}, {pipeline_mode = #tpu.pipeline_mode<synchronous>, transform_indices = @transform_1, window_bounds = array<i64: 64, 32>}, {pipeline_mode = #tpu.pipeline_mode<synchronous>, transform_indices = @transform_2, window_bounds = array<i64: 1, 32>}, {transform_indices = @transform_3, window_bounds = array<i64: 16, 32>}, {pipeline_mode = #tpu.pipeline_mode<synchronous>, transform_indices = @transform_4, window_bounds = array<i64: 1, 32>}, {pipeline_mode = #tpu.pipeline_mode<synchronous>, transform_indices = @transform_5, window_bounds = array<i64: 1, 32>}, {transform_indices = @transform_6, window_bounds = array<i64: 16, 32>}]} {
    %c0 = arith.constant 0 : index
    %c0_0 = arith.constant 0 : index
    %0 = vector.load %arg1[%c0, %c0_0] : memref<16x64xbf16, #tpu.memory_space<vmem>>, vector<16x64xbf16>
    %c0_1 = arith.constant 0 : index
    %c0_2 = arith.constant 0 : index
    %1 = vector.load %arg2[%c0_1, %c0_2] : memref<64x32xbf16, #tpu.memory_space<vmem>>, vector<64x32xbf16>
    %cst = arith.constant dense<0.000000e+00> : vector<16x32xf32>
    %2 = tpu.matmul %0, %1, %cst {dimension_numbers = #tpu.dot_dimension_numbers<[1], [0], [0], [1], [0, 0, 1, 1], [], []>} : vector<16x64xbf16>, vector<64x32xbf16>, vector<16x32xf32> -> vector<16x32xf32>
    %c0_3 = arith.constant 0 : index
    %c0_4 = arith.constant 0 : index
    %3 = vector.load %arg3[%c0_3, %c0_4] : memref<1x32xf32, #tpu.memory_space<vmem>>, vector<1x32xf32>
    %4 = vector.broadcast %3 : vector<1x32xf32> to vector<16x32xf32>
    %5 = arith.addf %2, %4 : vector<16x32xf32>
    %c0_5 = arith.constant 0 : index
    %c0_6 = arith.constant 0 : index
    %6 = vector.load %arg4[%c0_5, %c0_6] : memref<16x32xbf16, #tpu.memory_space<vmem>>, vector<16x32xbf16>
    %7 = arith.extf %6 : vector<16x32xbf16> to vector<16x32xf32>
    %8 = arith.addf %5, %7 : vector<16x32xf32>
    %cst_7 = arith.constant dense<0.000000e+00> : vector<16xf32>
    %9 = vector.multi_reduction <add>, %8, %cst_7 [1] : vector<16x32xf32> to vector<16xf32>
    %10 = vector.shape_cast %9 : vector<16xf32> to vector<16x1xf32>
    %cst_8 = arith.constant 3.200000e+01 : f32
    %11 = vector.broadcast %cst_8 : f32 to vector<16x1xf32>
    %12 = arith.divf %10, %11 : vector<16x1xf32>
    %13 = vector.broadcast %12 : vector<16x1xf32> to vector<16x32xf32>
    %14 = arith.subf %8, %13 : vector<16x32xf32>
    %15 = arith.mulf %14, %14 : vector<16x32xf32>
    %cst_9 = arith.constant dense<0.000000e+00> : vector<16xf32>
    %16 = vector.multi_reduction <add>, %15, %cst_9 [1] : vector<16x32xf32> to vector<16xf32>
    %17 = vector.shape_cast %16 : vector<16xf32> to vector<16x1xf32>
    %cst_10 = arith.constant 3.200000e+01 : f32
    %18 = vector.broadcast %cst_10 : f32 to vector<16x1xf32>
    %19 = arith.divf %17, %18 : vector<16x1xf32>
    %cst_11 = arith.constant 9.99999996E-13 : f32
    %20 = vector.broadcast %cst_11 : f32 to vector<16x1xf32>
    %21 = arith.addf %19, %20 : vector<16x1xf32>
    %22 = math.rsqrt %21 : vector<16x1xf32>
    %23 = vector.broadcast %22 : vector<16x1xf32> to vector<16x32xf32>
    %24 = arith.mulf %14, %23 : vector<16x32xf32>
    %c0_12 = arith.constant 0 : index
    %c0_13 = arith.constant 0 : index
    %25 = vector.load %arg5[%c0_12, %c0_13] : memref<1x32xf32, #tpu.memory_space<vmem>>, vector<1x32xf32>
    %26 = vector.broadcast %25 : vector<1x32xf32> to vector<16x32xf32>
    %27 = arith.mulf %24, %26 : vector<16x32xf32>
    %c0_14 = arith.constant 0 : index
    %c0_15 = arith.constant 0 : index
    %28 = vector.load %arg6[%c0_14, %c0_15] : memref<1x32xf32, #tpu.memory_space<vmem>>, vector<1x32xf32>
    %29 = vector.broadcast %28 : vector<1x32xf32> to vector<16x32xf32>
    %30 = arith.addf %27, %29 : vector<16x32xf32>
    %31 = arith.truncf %30 : vector<16x32xf32> to vector<16x32xbf16>
    %c0_16 = arith.constant 0 : index
    %c0_17 = arith.constant 0 : index
    %32 = vector.load %arg7[%c0_16, %c0_17] : memref<16x32xbf16, #tpu.memory_space<vmem>>, vector<16x32xbf16>
    tpu.vector_store %arg7[%c0_16, %c0_17], %31 {strides = array<i32>} : memref<16x32xbf16, #tpu.memory_space<vmem>>, vector<16x32xbf16>,
    return
  }
  func.func @transform_0(%arg0: i32) -> (i32, i32) {
    %c0_i32 = arith.constant 0 : i32
    %c0_i32_0 = arith.constant 0 : i32
    return %arg0, %c0_i32 : i32, i32
  }
  func.func @transform_1(%arg0: i32) -> (i32, i32) {
    %c0_i32 = arith.constant 0 : i32
    %c0_i32_0 = arith.constant 0 : i32
    %c0_i32_1 = arith.constant 0 : i32
    return %c0_i32, %c0_i32_0 : i32, i32
  }
  func.func @transform_2(%arg0: i32) -> (i32, i32) {
    %c0_i32 = arith.constant 0 : i32
    %c0_i32_0 = arith.constant 0 : i32
    %c0_i32_1 = arith.constant 0 : i32
    return %c0_i32, %c0_i32_0 : i32, i32
  }
  func.func @transform_3(%arg0: i32) -> (i32, i32) {
    %c0_i32 = arith.constant 0 : i32
    %c0_i32_0 = arith.constant 0 : i32
    return %arg0, %c0_i32 : i32, i32
  }
  func.func @transform_4(%arg0: i32) -> (i32, i32) {
    %c0_i32 = arith.constant 0 : i32
    %c0_i32_0 = arith.constant 0 : i32
    %c0_i32_1 = arith.constant 0 : i32
    return %c0_i32, %c0_i32_0 : i32, i32
  }
  func.func @transform_5(%arg0: i32) -> (i32, i32) {
    %c0_i32 = arith.constant 0 : i32
    %c0_i32_0 = arith.constant 0 : i32
    %c0_i32_1 = arith.constant 0 : i32
    return %c0_i32, %c0_i32_0 : i32, i32
  }
  func.func @transform_6(%arg0: i32) -> (i32, i32) {
    %c0_i32 = arith.constant 0 : i32
    %c0_i32_0 = arith.constant 0 : i32
    return %arg0, %c0_i32 : i32, i32
  }
}

module attributes {stable_mosaic.version = 11 : i64} {
  func.func @_pointer_ce_kernel(%arg0: i32, %arg1: memref<2x8x32xbf16, #tpu.memory_space<vmem>>, %arg2: memref<1x32xf32, #tpu.memory_space<vmem>>, %arg3: memref<2x8xf32, #tpu.memory_space<vmem>>, %arg4: memref<2x1xi32, #tpu.memory_space<vmem>>, %arg5: memref<2x8xf32, #tpu.memory_space<vmem>>, %arg6: memref<2x1xf32, #tpu.memory_space<vmem>>) attributes {dimension_semantics = [#tpu.dimension_semantics<parallel>], iteration_bounds = array<i64: 1>, scalar_prefetch = 0 : i64, scratch_operands = 0 : i64, tpu.core_type = #tpu.core_type<tc>, window_params = [{transform_indices = @transform_0, window_bounds = array<i64: 2, 8, 32>}, {pipeline_mode = #tpu.pipeline_mode<synchronous>, transform_indices = @transform_1, window_bounds = array<i64: 1, 32>}, {transform_indices = @transform_2, window_bounds = array<i64: 2, 8>}, {transform_indices = @transform_3, window_bounds = array<i64: 2, 1>}, {transform_indices = @transform_4, window_bounds = array<i64: 2, 8>}, {transform_indices = @transform_5, window_bounds = array<i64: 2, 1>}]} {
    %c0 = arith.constant 0 : index
    %c0_0 = arith.constant 0 : index
    %c0_1 = arith.constant 0 : index
    %0 = vector.load %arg1[%c0, %c0_0, %c0_1] : memref<2x8x32xbf16, #tpu.memory_space<vmem>>, vector<2x8x32xbf16>
    %c0_2 = arith.constant 0 : index
    %c0_3 = arith.constant 0 : index
    %1 = vector.load %arg2[%c0_2, %c0_3] : memref<1x32xf32, #tpu.memory_space<vmem>>, vector<1x32xf32>
    %c0_4 = arith.constant 0 : index
    %c0_5 = arith.constant 0 : index
    %2 = vector.load %arg3[%c0_4, %c0_5] : memref<2x8xf32, #tpu.memory_space<vmem>>, vector<2x8xf32>
    %3 = arith.extf %0 : vector<2x8x32xbf16> to vector<2x8x32xf32>
    %4 = vector.shape_cast %1 : vector<1x32xf32> to vector<1x1x32xf32>
    %5 = vector.broadcast %4 : vector<1x1x32xf32> to vector<2x8x32xf32>
    %6 = arith.mulf %3, %5 : vector<2x8x32xf32>
    %cst = arith.constant dense<0.000000e+00> : vector<2x8xf32>
    %7 = vector.multi_reduction <add>, %6, %cst [2] : vector<2x8x32xf32> to vector<2x8xf32>
    %8 = arith.mulf %7, %2 : vector<2x8xf32>
    %cst_6 = arith.constant 1.000000e+00 : f32
    %9 = vector.broadcast %cst_6 : f32 to vector<2x8xf32>
    %10 = arith.subf %9, %2 : vector<2x8xf32>
    %cst_7 = arith.constant 3.40282347E+38 : f32
    %11 = vector.broadcast %cst_7 : f32 to vector<2x8xf32>
    %12 = arith.mulf %10, %11 : vector<2x8xf32>
    %13 = arith.subf %8, %12 : vector<2x8xf32>
    %c0_8 = arith.constant 0 : index
    %c0_9 = arith.constant 0 : index
    %14 = vector.load %arg5[%c0_8, %c0_9] : memref<2x8xf32, #tpu.memory_space<vmem>>, vector<2x8xf32>
    tpu.vector_store %arg5[%c0_8, %c0_9], %13 {strides = array<i32>} : memref<2x8xf32, #tpu.memory_space<vmem>>, vector<2x8xf32>,
    %cst_10 = arith.constant dense<0xFF800000> : vector<2xf32>
    %15 = vector.multi_reduction <maximumf>, %13, %cst_10 [1] : vector<2x8xf32> to vector<2xf32>
    %16 = vector.shape_cast %15 : vector<2xf32> to vector<2x1xf32>
    %17 = vector.broadcast %16 : vector<2x1xf32> to vector<2x8xf32>
    %18 = arith.subf %13, %17 : vector<2x8xf32>
    %19 = math.exp %18 : vector<2x8xf32>
    %cst_11 = arith.constant dense<0.000000e+00> : vector<2xf32>
    %20 = vector.multi_reduction <add>, %19, %cst_11 [1] : vector<2x8xf32> to vector<2xf32>
    %21 = vector.shape_cast %20 : vector<2xf32> to vector<2x1xf32>
    %22 = math.log %21 : vector<2x1xf32>
    %23 = arith.addf %22, %16 : vector<2x1xf32>
    %c0_12 = arith.constant 0 : index
    %c0_13 = arith.constant 0 : index
    %24 = vector.load %arg4[%c0_12, %c0_13] : memref<2x1xi32, #tpu.memory_space<vmem>>, vector<2x1xi32>
    %25 = tpu.iota {dimensions = array<i32: 1>} : vector<2x8xi32>
    %26 = vector.broadcast %24 : vector<2x1xi32> to vector<2x8xi32>
    %27 = arith.cmpi eq, %25, %26 : vector<2x8xi32>
    %cst_14 = arith.constant 0.000000e+00 : f32
    %28 = vector.broadcast %cst_14 : f32 to vector<2x8xf32>
    %29 = arith.select %27, %13, %28 : vector<2x8xi1>, vector<2x8xf32>
    %cst_15 = arith.constant dense<0.000000e+00> : vector<2xf32>
    %30 = vector.multi_reduction <add>, %29, %cst_15 [1] : vector<2x8xf32> to vector<2xf32>
    %31 = vector.shape_cast %30 : vector<2xf32> to vector<2x1xf32>
    %32 = arith.subf %23, %31 : vector<2x1xf32>
    %c0_16 = arith.constant 0 : index
    %c0_17 = arith.constant 0 : index
    %33 = vector.load %arg6[%c0_16, %c0_17] : memref<2x1xf32, #tpu.memory_space<vmem>>, vector<2x1xf32>
    tpu.vector_store %arg6[%c0_16, %c0_17], %32 {strides = array<i32>} : memref<2x1xf32, #tpu.memory_space<vmem>>, vector<2x1xf32>,
    return
  }
  func.func @transform_0(%arg0: i32) -> (i32, i32, i32) {
    %c0_i32 = arith.constant 0 : i32
    %c0_i32_0 = arith.constant 0 : i32
    %c0_i32_1 = arith.constant 0 : i32
    return %arg0, %c0_i32, %c0_i32_0 : i32, i32, i32
  }
  func.func @transform_1(%arg0: i32) -> (i32, i32) {
    %c0_i32 = arith.constant 0 : i32
    %c0_i32_0 = arith.constant 0 : i32
    %c0_i32_1 = arith.constant 0 : i32
    return %c0_i32, %c0_i32_0 : i32, i32
  }
  func.func @transform_2(%arg0: i32) -> (i32, i32) {
    %c0_i32 = arith.constant 0 : i32
    %c0_i32_0 = arith.constant 0 : i32
    return %arg0, %c0_i32 : i32, i32
  }
  func.func @transform_3(%arg0: i32) -> (i32, i32) {
    %c0_i32 = arith.constant 0 : i32
    %c0_i32_0 = arith.constant 0 : i32
    return %arg0, %c0_i32 : i32, i32
  }
  func.func @transform_4(%arg0: i32) -> (i32, i32) {
    %c0_i32 = arith.constant 0 : i32
    %c0_i32_0 = arith.constant 0 : i32
    return %arg0, %c0_i32 : i32, i32
  }
  func.func @transform_5(%arg0: i32) -> (i32, i32) {
    %c0_i32 = arith.constant 0 : i32
    %c0_i32_0 = arith.constant 0 : i32
    return %arg0, %c0_i32 : i32, i32
  }
}

module attributes {stable_mosaic.version = 11 : i64} {
  func.func @_dense_kernel(%arg0: i32, %arg1: memref<16x32xbf16, #tpu.memory_space<vmem>>, %arg2: memref<32x64xbf16, #tpu.memory_space<vmem>>, %arg3: memref<1x64xf32, #tpu.memory_space<vmem>>, %arg4: memref<16x64xbf16, #tpu.memory_space<vmem>>) attributes {dimension_semantics = [#tpu.dimension_semantics<parallel>], iteration_bounds = array<i64: 1>, scalar_prefetch = 0 : i64, scratch_operands = 0 : i64, tpu.core_type = #tpu.core_type<tc>, window_params = [{transform_indices = @transform_0, window_bounds = array<i64: 16, 32>}, {pipeline_mode = #tpu.pipeline_mode<synchronous>, transform_indices = @transform_1, window_bounds = array<i64: 32, 64>}, {pipeline_mode = #tpu.pipeline_mode<synchronous>, transform_indices = @transform_2, window_bounds = array<i64: 1, 64>}, {transform_indices = @transform_3, window_bounds = array<i64: 16, 64>}]} {
    %c0 = arith.constant 0 : index
    %c0_0 = arith.constant 0 : index
    %0 = vector.load %arg1[%c0, %c0_0] : memref<16x32xbf16, #tpu.memory_space<vmem>>, vector<16x32xbf16>
    %c0_1 = arith.constant 0 : index
    %c0_2 = arith.constant 0 : index
    %1 = vector.load %arg2[%c0_1, %c0_2] : memref<32x64xbf16, #tpu.memory_space<vmem>>, vector<32x64xbf16>
    %cst = arith.constant dense<0.000000e+00> : vector<16x64xf32>
    %2 = tpu.matmul %0, %1, %cst {dimension_numbers = #tpu.dot_dimension_numbers<[1], [0], [0], [1], [0, 0, 1, 1], [], []>} : vector<16x32xbf16>, vector<32x64xbf16>, vector<16x64xf32> -> vector<16x64xf32>
    %c0_3 = arith.constant 0 : index
    %c0_4 = arith.constant 0 : index
    %3 = vector.load %arg3[%c0_3, %c0_4] : memref<1x64xf32, #tpu.memory_space<vmem>>, vector<1x64xf32>
    %4 = vector.broadcast %3 : vector<1x64xf32> to vector<16x64xf32>
    %5 = arith.addf %2, %4 : vector<16x64xf32>
    %cst_5 = arith.constant 5.000000e-01 : f32
    %6 = vector.broadcast %cst_5 : f32 to vector<16x64xf32>
    %7 = arith.mulf %6, %5 : vector<16x64xf32>
    %cst_6 = arith.constant 4.471500e-02 : f32
    %8 = vector.broadcast %cst_6 : f32 to vector<16x64xf32>
    %9 = arith.mulf %8, %5 : vector<16x64xf32>
    %10 = arith.mulf %9, %5 : vector<16x64xf32>
    %11 = arith.mulf %10, %5 : vector<16x64xf32>
    %12 = arith.addf %5, %11 : vector<16x64xf32>
    %cst_7 = arith.constant 0.797884583 : f32
    %13 = vector.broadcast %cst_7 : f32 to vector<16x64xf32>
    %14 = arith.mulf %13, %12 : vector<16x64xf32>
    %15 = math.tanh %14 : vector<16x64xf32>
    %cst_8 = arith.constant 1.000000e+00 : f32
    %16 = vector.broadcast %cst_8 : f32 to vector<16x64xf32>
    %17 = arith.addf %16, %15 : vector<16x64xf32>
    %18 = arith.mulf %7, %17 : vector<16x64xf32>
    %19 = arith.truncf %18 : vector<16x64xf32> to vector<16x64xbf16>
    %c0_9 = arith.constant 0 : index
    %c0_10 = arith.constant 0 : index
    %20 = vector.load %arg4[%c0_9, %c0_10] : memref<16x64xbf16, #tpu.memory_space<vmem>>, vector<16x64xbf16>
    tpu.vector_store %arg4[%c0_9, %c0_10], %19 {strides = array<i32>} : memref<16x64xbf16, #tpu.memory_space<vmem>>, vector<16x64xbf16>,
    return
  }
  func.func @transform_0(%arg0: i32) -> (i32, i32) {
    %c0_i32 = arith.constant 0 : i32
    %c0_i32_0 = arith.constant 0 : i32
    return %arg0, %c0_i32 : i32, i32
  }
  func.func @transform_1(%arg0: i32) -> (i32, i32) {
    %c0_i32 = arith.constant 0 : i32
    %c0_i32_0 = arith.constant 0 : i32
    %c0_i32_1 = arith.constant 0 : i32
    return %c0_i32, %c0_i32_0 : i32, i32
  }
  func.func @transform_2(%arg0: i32) -> (i32, i32) {
    %c0_i32 = arith.constant 0 : i32
    %c0_i32_0 = arith.constant 0 : i32
    %c0_i32_1 = arith.constant 0 : i32
    return %c0_i32, %c0_i32_0 : i32, i32
  }
  func.func @transform_3(%arg0: i32) -> (i32, i32) {
    %c0_i32 = arith.constant 0 : i32
    %c0_i32_0 = arith.constant 0 : i32
    return %arg0, %c0_i32 : i32, i32
  }
}

</mosaic_0001>

<bundles_post_ra>
// kernel: pointer_bert_forward.12
= control target key start
LH: loop header
LB: loop body
LE: loop exit
PB: predicated region body
PF: predicated region fallthrough
CT: control target
= control target key end

     0   :  { %vm16_vm0 = vcmask 261120   ;;  %vm70_vm1 = vcmask 257024   ;;  %s129_s0 = inlined_call_operand.vmem [shape: f32[16,32], index: 0, kind: input, shape index: {}]   ;;  %s130_s1 = inlined_call_operand.vmem [shape: f32[1,32], index: 1, kind: input, shape index: {}]   ;;  %s131_s2 = inlined_call_operand.vmem [shape: f32[1,32], index: 2, kind: input, shape index: {}]   ;;  %s132_s3 = inlined_call_operand.vmem [shape: bf16[16,32], index: 3, kind: output, shape index: {}]  }
   0x1   :  { %v14_v0 = vld [vmem:[%s129_s0] sm:$0xff]  ;;  %v15_v1 = vld [vmem:[%s129_s0 + $0x8] sm:$0xff] }
   0x2   :  { %v17_v2 = vsel %vm16_vm0, %v14_v0, 0.0  ;;  %v20_v3 = vsel %vm16_vm0, %v15_v1, 0.0  ;;  %v77_v21 = vld [vmem:[%s130_s1] ss:$0 sm:$0xff] }
   0x3   :  { %18 = vadd.xlane.f32.xlu0 %v17_v2  ;;  %v78_v23 = vld [vmem:[%s131_s2] ss:$0 sm:$0xff] }
   0x7   :  { %21 = vadd.xlane.f32.xlu0 %v20_v3 }
  0x8c   :  { %v19_v4 = vpop.xlane.xlu0 %18 }
  0x8d   :  { %v24_v5 = vmul.f32 0.03125, %v19_v4 }
  0x8f   :  { %v26_v6 = vsub.f32 %v14_v0, %v24_v5 }
  0x90   :  { %v22_v7 = vpop.xlane.xlu0 %21 }
  0x91   :  { %v25_v8 = vmul.f32 0.03125, %v22_v7  ;;  %v28_v9 = vmul.f32 %v26_v6, %v26_v6 }
  0x93   :  { %v27_v10 = vsub.f32 %v15_v1, %v25_v8  ;;  %v30_v11 = vsel %vm16_vm0, %v28_v9, 0.0 }
  0x94   :  { %31 = vadd.xlane.f32.xlu1 %v30_v11 }
  0x95   :  { %v29_v12 = vmul.f32 %v27_v10, %v27_v10 }
  0x97   :  { %v33_v13 = vsel %vm16_vm0, %v29_v12, 0.0 }
  0x98   :  { %34 = vadd.xlane.f32.xlu1 %v33_v13 }
 0x11d   :  { %v32_v14 = vpop.xlane.xlu1 %31 }
 0x11e   :  { %v36_v15 = vmul.f32 0.03125, %v32_v14 }
 0x120   :  { %v38_v16 = vadd.f32 1e-12, %v36_v15 }
 0x121   :  { %v35_v17 = vpop.xlane.xlu1 %34 }
 0x122   :  { %83 = vrsqrt.f32 %v38_v16  ;;  %v37_v18 = vmul.f32 0.03125, %v35_v17 }
 0x124   :  { %v39_v19 = vadd.f32 1e-12, %v37_v18 }
 0x126   :  { %85 = vrsqrt.f32 %v39_v19 }
 0x12f   :  { %v84_v20 = vpop.eup %83 }
 0x130   :  { %v42_v22 = vmul.f32 %v84_v20, %v26_v6 }
 0x132   :  { %v51_v24 = vmul.f32 %v77_v21, %v42_v22 }
 0x133   :  { %v86_v25 = vpop.eup %85 }
 0x134   :  { %v60_v26 = vadd.f32 %v78_v23, %v51_v24  ;;  %v43_v27 = vmul.f32 %v86_v25, %v27_v10 }
 0x136   :  { %v81_v28 = vpack.c.bf16 %v60_v26, %v60_v26  ;;  %v52_v29 = vmul.f32 %v77_v21, %v43_v27 }
 0x138   :  { %71 = vst.msk [vmem:[%s132_s3] sm:$0xf] %vm70_vm1, %v81_v28  ;;  %v61_v30 = vadd.f32 %v78_v23, %v52_v29 }
 0x13a   :  { %v82_v31 = vpack.c.bf16 %v61_v30, %v61_v30 }
 0x13c   :  { %72 = vst.msk [vmem:[%s132_s3 + $0x4] sm:$0xf] %vm70_vm1, %v82_v31 }

// kernel: pointer_bert_forward.13
= control target key start
LH: loop header
LB: loop body
LE: loop exit
PB: predicated region body
PF: predicated region fallthrough
CT: control target
= control target key end

     0   :  { %v130_v0 = vmov 0.0   ;;  %vm131_vm0 = vmmov 0   ;;  %vm45_vm1 = vcmask 261120   ;;  %vm98_vm2 = vcmask 781312   ;;  %s170_s1 = inlined_call_operand.vmem [shape: bf16[32,96], index: 1, kind: input, shape index: {}]   ;;  %s171_s0 = inlined_call_operand.vmem [shape: bf16[16,32], index: 0, kind: input, shape index: {}]   ;;  %s172_s2 = inlined_call_operand.vmem [shape: f32[1,96], index: 2, kind: input, shape index: {}]   ;;  %s173_s3 = inlined_call_operand.vmem [shape: bf16[16,96], index: 3, kind: output, shape index: {}]  }
   0x1   :  { %117 = vmatprep.subr.bf16.mxu0 %v130_v0  ;;  %v127_v1 = vld [vmem:[%s170_s1 + $0x8] sm:$0xff]   ;;  %121 = vmatprep.mubr.msk.bf16.mxu0 %vm131_vm0, %v130_v0  ;;  %v128_v2 = vld [vmem:[%s170_s1] sm:$0xff]  }
   0x2   :  { %118 = vmatpush3.bf16.msra.mxu0 %v127_v1  ;;  %v129_v3 = vld [vmem:[%s171_s0] sm:$0xff]  }
   0x3   :  { %119 = vmatprep.subr.bf16.mxu0 %v130_v0  ;;  %v105_v4 = vld [vmem:[%s172_s2] ss:$0 sm:$0xff] }
   0x6   :  { %120 = vmatpush3.bf16.msra.mxu0 %v128_v2 }
   0x9   :  { %122 = vmatmul.mubr.msk.bf16.vlgmr.msra.gmra.mxu0 %vm45_vm1, %v129_v3 }
  0xc9   :  { %v83_v5 = vpop.f32.mrf.mxu0 }
  0xca   :  { %v84_v6 = vadd.f32 %v105_v4, %v83_v5 }
  0xcb   :  { %v123_v7 = vpop.f32.mrf.mxu0 }
  0xcc   :  { %v112_v8 = vpack.c.bf16 %v84_v6, %v84_v6 }
  0xcd   :  { %v86_v9 = vpop.f32.mrf.mxu0 }
  0xce   :  { %99 = vst.msk [vmem:[%s173_s3] sm:$0xf] %vm98_vm2, %v112_v8  ;;  %v87_v10 = vadd.f32 %v105_v4, %v86_v9 }
  0xcf   :  { %v124_v11 = vpop.f32.mrf.mxu0 }
  0xd0   :  { %v113_v12 = vpack.c.bf16 %v87_v10, %v87_v10 }
  0xd2   :  { %100 = vst.msk [vmem:[%s173_s3 + $0x4] sm:$0xf] %vm98_vm2, %v113_v12 }

// kernel: pointer_bert_forward.14
= control target key start
LH: loop header
LB: loop body
LE: loop exit
PB: predicated region body
PF: predicated region fallthrough
CT: control target
= control target key end

     0   :  { %s571_s9 = smov 0   ;;  %s625_s0 = inlined_call_operand.vmem [shape: bf16[2,8,96], index: 0, kind: input, shape index: {}]   ;;  %s626_s1 = inlined_call_operand.vmem [shape: f32[2,1,8], index: 1, kind: input, shape index: {}]   ;;  %s627_s2 = inlined_call_operand.vmem [shape: bf16[2,8,32], index: 2, kind: output, shape index: {}]  }
   0x1 LB: > { %s465_s10 = sadd.s32 4294967295, %s546_s9   ;;  %p469_p0 = scmp.ge.s32.totalorder %s546_s9, 1  ;;  %s546_s9 = sphi %s571_s9, %s12_s9  }
   0x2   : > { %p119_p1 = scmp.lt.s32.totalorder %s546_s9, 3 }
   0x4   : > { %p120_p2 = pnand %p469_p0, %p119_p1 }
   0x5   : > { %p142_p3 = scmp.lt.s32.totalorder (!%p120_p2), %s465_s10, 1  ;;  %s550_s15 = smov (!%p120_p2), 96  }
   0x6   : > { %123 = sbr.rel (%p120_p2) target bundleno = 1477 (0x5c5), region = 28  ;;  %s551_s16 = smov (!%p120_p2), 64  }
   0x7   : > { %s552_s20 = smov (!%p120_p2), 80   ;;  %s553_s21 = smov (!%p120_p2), 112  }
   0x8   : > { %s554_s25 = smov (!%p120_p2), 48   ;;  %s555_s26 = smov (!%p120_p2), 16  }
   0xb   : > { %v548_v0 = vmov 0.0   ;;  %vm549_vm0 = vmmov 0   ;;  %s629_s10 = smov (!%p142_p3, %s465_s10), 1  ;;  %vm169_vm1 = vcmask 130048   ;;  %vm216_vm2 = vcmask 64512  }
   0xc   : > { %491 = vmatprep.subr.bf16.mxu0 %v548_v0  ;;  %493 = vmatprep.mubr.msk.bf16.mxu0 %vm549_vm0, %v548_v0  ;;  %s470_s11 = sshll.u32 %s629_s10, 2  ;;  %s148_s19 = scalar_lea.vmem %s626_s1, %s629_s10  ;;  %vm234_vm3 = vcmask 1043456   ;;  %vm279_vm4 = vcmask 125952   ;;  %vm401_vm5 = vcmask 257152  }
   0xd   : > { %497 = vmatprep.subr.bf16.mxu1 %v548_v0  ;;  %499 = vmatprep.mubr.msk.bf16.mxu1 %vm549_vm0, %v548_v0  ;;  %s145_s14 = scalar_lea.vmem %s625_s0, %s470_s11  ;;  %v472_v6 = vld [vmem:[%s148_s19] ss:$0 sm:$0xff]  ;;  %s613_s24 = scalar_lea.vmem %s627_s2, %s470_s11 }
   0xe   : > { %v155_v1 = vld [vmem:[%s145_s14] sm:$0xf] }
   0xf   : > { %v589_v2 = vcombine.low %v155_v1, %v155_v1  ;;  %v157_v5 = vmul.bf16 1048592000, %v155_v1 }
  0x11   : > { %167 = vrot.lane.b32.xlu0 %v589_v2, %s550_s15  ;;  %229 = vrot.lane.b32.xlu1 %v589_v2, %s551_s16  ;;  %v476_v20 = vcombine.low %v157_v5, %v157_v5 }
  0x83   : > { %v168_v3 = vpop.permute.xlu0 %167  ;;  %v230_v13 = vpop.permute.xlu1 %229 }
  0x84   : > { %v174_v4 = vsel %vm169_vm1, %v168_v3, 0  ;;  %v236_v14 = vsel %vm234_vm3, %v230_v13, 0 }
  0x85   : > { %492 = vmatpush3.bf16.xpose.msra.mxu0 %v174_v4  ;;  %498 = vmatpush3.bf16.msra.mxu1 %v236_v14 }
  0x86   : > { %509 = vmatprep.subr.bf16.mxu0 %v548_v0  ;;  %503 = vmatprep.subr.bf16.mxu1 %v548_v0 }
  0x8c   : > { %494 = vmatmul.mubr.msk.bf16.vlgmr.msra.gmra.mxu0 %vm169_vm1, %v157_v5 }
  0x8d   : > { %511 = vmatprep.mubr.msk.bf16.mxu0 %vm549_vm0, %v548_v0 }
 0x14c   : > { %v210_v7 = vpop.f32.mrf.mxu0 }
 0x14d   : > { %v211_v8 = vadd.f32 %v472_v6, %v210_v7 }
 0x14e   : > { %v495_v9 = vpop.f32.mrf.mxu0 }
 0x14f   : > { %v217_v10 = vsel %vm216_vm2, %v211_v8, -inf }
 0x150   : > { %218 = vmax.xlane.f32.xlu0 %v217_v10  ;;  %v213_v11 = vpop.f32.mrf.mxu0 }
 0x152   : > { %v496_v12 = vpop.f32.mrf.mxu0 }
 0x1d9   : > { %v219_v15 = vpop.xlane.xlu0 %218 }
 0x1da   : > { %v220_v16 = vsub.f32 %v211_v8, %v219_v15 }
 0x1dc   : > { %v221_v17 = vmul.f32 1.442695, %v220_v16 }
 0x1de   : > { %532 = vpow2.f32 %v221_v17 }
 0x1eb   : > { %v533_v18 = vpop.eup %532 }
 0x1ec   : > { %v223_v19 = vsel %vm216_vm2, %v533_v18, 0.0 }
 0x1ed   : > { %224 = vadd.xlane.f32.xlu1 %v223_v19 }
 0x1fe   : > { %286 = vrot.lane.b32.xlu1 %v589_v2, %s552_s20 }
 0x202   : > { %284 = vrot.lane.b32.xlu1 %v476_v20, %s553_s21 }
 0x276   : > { %v225_v21 = vpop.xlane.xlu1 %224 }
 0x277   : > { %534 = vrcp.f32 %v225_v21 }
 0x27a   : > { %v287_v23 = vpop.permute.xlu1 %286 }
 0x27b   : > { %v292_v25 = vsel %vm169_vm1, %v287_v23, 0 }
 0x27e   : > { %v285_v27 = vpop.permute.xlu1 %284 }
 0x284   : > { %v535_v22 = vpop.eup %534 }
 0x285   : > { %v227_v24 = vmul.f32 %v535_v22, %v533_v18 }
 0x287   : > { %v228_v26 = vpack.c.bf16 %v227_v24, %v227_v24 }
 0x289   : > { %500 = vmatmul.mubr.msk.bf16.vlgmr.msra.gmra.mxu1 %vm216_vm2, %v228_v26 }
 0x28a   : > { %504 = vmatpush3.bf16.xpose.msra.mxu1 %v292_v25  ;;  %505 = vmatprep.mubr.msk.bf16.mxu1 %vm549_vm0, %v548_v0 }
 0x291   : > { %506 = vmatmul.mubr.msk.bf16.vlgmr.msra.gmra.mxu1 %vm169_vm1, %v285_v27 }
 0x349   : > { %v272_v28 = vpop.f32.mrf.mxu1 }
 0x34a   : > { %v278_v29 = vpack.c.bf16 %v272_v28, %v272_v28 }
 0x34b   : > { %v501_v30 = vpop.f32.mrf.mxu1 }
 0x34c   : > { %280 = vst.msk [vmem:[%s613_s24] sm:$0xf] %vm279_vm4, %v278_v29 }
 0x34d   : > { %v275_v31 = vpop.f32.mrf.mxu1 }
 0x34f   : > { %v502_v32 = vpop.f32.mrf.mxu1 }
 0x351   : > { %v328_v33 = vpop.f32.mrf.mxu1 }
 0x352   : > { %v329_v34 = vadd.f32 %v472_v6, %v328_v33 }
 0x353   : > { %v507_v35 = vpop.f32.mrf.mxu1 }
 0x354   : > { %v334_v36 = vsel %vm216_vm2, %v329_v34, -inf }
 0x355   : > { %335 = vmax.xlane.f32.xlu1 %v334_v36  ;;  %v331_v37 = vpop.f32.mrf.mxu1 }
 0x357   : > { %v508_v38 = vpop.f32.mrf.mxu1 }
 0x3de   : > { %v336_v39 = vpop.xlane.xlu1 %335 }
 0x3df   : > { %v337_v40 = vsub.f32 %v329_v34, %v336_v39 }
 0x3e1   : > { %v338_v41 = vmul.f32 1.442695, %v337_v40 }
 0x3e3   : > { %536 = vpow2.f32 %v338_v41 }
 0x3f0   : > { %v537_v42 = vpop.eup %536 }
 0x3f1   : > { %v340_v43 = vsel %vm216_vm2, %v537_v42, 0.0 }
 0x3f2   : > { %341 = vadd.xlane.f32.xlu0 %v340_v43 }
 0x408   : > { %346 = vrot.lane.b32.xlu0 %v589_v2, %s554_s25 }
 0x47b   : > { %v342_v44 = vpop.xlane.xlu0 %341 }
 0x47c   : > { %538 = vrcp.f32 %v342_v44 }
 0x47f   : > { %v347_v45 = vpop.permute.xlu0 %346 }
 0x480   : > { %v352_v46 = vsel %vm234_vm3, %v347_v45, 0 }
 0x481   : > { %510 = vmatpush3.bf16.msra.mxu0 %v352_v46 }
 0x489   : > { %v539_v47 = vpop.eup %538 }
 0x48a   : > { %v344_v48 = vmul.f32 %v539_v47, %v537_v42 }
 0x48c   : > { %v345_v49 = vpack.c.bf16 %v344_v48, %v344_v48 }
 0x48e   : > { %512 = vmatmul.mubr.msk.bf16.vlgmr.msra.gmra.mxu0 %vm216_vm2, %v345_v49 }
 0x54e   : > { %v388_v50 = vpop.f32.mrf.mxu0 }
 0x54f   : > { %v482_v51 = vpack.c.bf16 %v388_v50, %v388_v50 }
 0x550   : > { %v513_v52 = vpop.f32.mrf.mxu0 }
 0x551   : > { %398 = vrot.lane.b32.xlu0 %v482_v51, %s555_s26 }
 0x552   : > { %v391_v53 = vpop.f32.mrf.mxu0 }
 0x554   : > { %v514_v54 = vpop.f32.mrf.mxu0 }
 0x5c3   : > { %v399_v55 = vpop.permute.xlu0 %398 }
 0x5c4   : > { %402 = vst.msk [vmem:[%s613_s24] sm:$0xf] %vm401_vm5, %v399_v55 }
 0x5c5 PF: > { %s12_s9 = sadd.s32 1, %s546_s9  }
 0x5c6   : > { %p9_p4 = scmp.ge.s32.totalorder %s12_s9, 4  }
 0x5c8   :  { %11 = sbr.rel (!%p9_p4) target bundleno = 1 (0x1), region = 61 }

// kernel: pointer_bert_forward.15
= control target key start
LH: loop header
LB: loop body
LE: loop exit
PB: predicated region body
PF: predicated region fallthrough
CT: control target
= control target key end

     0   :  { %v200_v0 = vmov 0.0   ;;  %vm201_vm0 = vmmov 0   ;;  %vm54_vm1 = vcmask 261120   ;;  %vm158_vm2 = vcmask 257024   ;;  %s269_s1 = inlined_call_operand.vmem [shape: bf16[32,32], index: 1, kind: input, shape index: {}]   ;;  %s270_s0 = inlined_call_operand.vmem [shape: bf16[16,32], index: 0, kind: input, shape index: {}]   ;;  %s271_s3 = inlined_call_operand.vmem [shape: bf16[16,32], index: 3, kind: input, shape index: {}]   ;;  %s272_s2 = inlined_call_operand.vmem [shape: f32[1,32], index: 2, kind: input, shape index: {}]   ;;  %s273_s4 = inlined_call_operand.vmem [shape: f32[1,32], index: 4, kind: input, shape index: {}]   ;;  %s274_s5 = inlined_call_operand.vmem [shape: f32[1,32], index: 5, kind: input, shape index: {}]   ;;  %s275_s6 = inlined_call_operand.vmem [shape: bf16[16,32], index: 6, kind: output, shape index: {}]  }
   0x1   :  { %183 = vmatprep.subr.bf16.mxu0 %v200_v0  ;;  %v193_v1 = vld [vmem:[%s269_s1 + $0x8] sm:$0xff]   ;;  %187 = vmatprep.mubr.msk.bf16.mxu0 %vm201_vm0, %v200_v0  ;;  %v194_v2 = vld [vmem:[%s269_s1] sm:$0xff]  }
   0x2   :  { %184 = vmatpush3.bf16.msra.mxu0 %v193_v1  ;;  %v195_v3 = vld [vmem:[%s270_s0] sm:$0xff]  }
   0x3   :  { %185 = vmatprep.subr.bf16.mxu0 %v200_v0  ;;  %v177_v4 = vld [vmem:[%s271_s3] sm:$0xff]  }
   0x4   :  { %v165_v5 = vld [vmem:[%s272_s2] ss:$0 sm:$0xff]  ;;  %v178_v6 = vunpack.c.l.bf16 %v177_v4  ;;  %v179_v11 = vunpack.c.h.bf16 %v177_v4 }
   0x5   :  { %v170_v35 = vld [vmem:[%s273_s4] ss:$0 sm:$0xff] }
   0x6   :  { %186 = vmatpush3.bf16.msra.mxu0 %v194_v2  ;;  %v171_v37 = vld [vmem:[%s274_s5] ss:$0 sm:$0xff] }
   0x9   :  { %188 = vmatmul.mubr.msk.bf16.vlgmr.msra.gmra.mxu0 %vm54_vm1, %v195_v3 }
  0xc9   :  { %v92_v7 = vpop.f32.mrf.mxu0 }
  0xca   :  { %v93_v8 = vadd.f32 %v165_v5, %v92_v7 }
  0xcb   :  { %v189_v9 = vpop.f32.mrf.mxu0 }
  0xcc   :  { %v103_v10 = vadd.f32 %v178_v6, %v93_v8 }
  0xcd   :  { %v95_v12 = vpop.f32.mrf.mxu0 }
  0xce   :  { %v96_v13 = vadd.f32 %v165_v5, %v95_v12  ;;  %v105_v14 = vsel %vm54_vm1, %v103_v10, 0.0 }
  0xcf   :  { %106 = vadd.xlane.f32.xlu0 %v105_v14  ;;  %v190_v15 = vpop.f32.mrf.mxu0 }
  0xd0   :  { %v104_v16 = vadd.f32 %v179_v11, %v96_v13 }
  0xd2   :  { %v108_v17 = vsel %vm54_vm1, %v104_v16, 0.0 }
  0xd3   :  { %109 = vadd.xlane.f32.xlu0 %v108_v17 }
 0x158   :  { %v107_v18 = vpop.xlane.xlu0 %106 }
 0x159   :  { %v112_v19 = vmul.f32 0.03125, %v107_v18 }
 0x15b   :  { %v114_v20 = vsub.f32 %v103_v10, %v112_v19 }
 0x15c   :  { %v110_v21 = vpop.xlane.xlu0 %109 }
 0x15d   :  { %v113_v22 = vmul.f32 0.03125, %v110_v21  ;;  %v116_v23 = vmul.f32 %v114_v20, %v114_v20 }
 0x15f   :  { %v115_v24 = vsub.f32 %v104_v16, %v113_v22  ;;  %v118_v25 = vsel %vm54_vm1, %v116_v23, 0.0 }
 0x160   :  { %119 = vadd.xlane.f32.xlu1 %v118_v25 }
 0x161   :  { %v117_v26 = vmul.f32 %v115_v24, %v115_v24 }
 0x163   :  { %v121_v27 = vsel %vm54_vm1, %v117_v26, 0.0 }
 0x164   :  { %122 = vadd.xlane.f32.xlu1 %v121_v27 }
 0x1e9   :  { %v120_v28 = vpop.xlane.xlu1 %119 }
 0x1ea   :  { %v124_v29 = vmul.f32 0.03125, %v120_v28 }
 0x1ec   :  { %v126_v30 = vadd.f32 1e-12, %v124_v29 }
 0x1ed   :  { %v123_v31 = vpop.xlane.xlu1 %122 }
 0x1ee   :  { %196 = vrsqrt.f32 %v126_v30  ;;  %v125_v32 = vmul.f32 0.03125, %v123_v31 }
 0x1f0   :  { %v127_v33 = vadd.f32 1e-12, %v125_v32 }
 0x1f2   :  { %198 = vrsqrt.f32 %v127_v33 }
 0x1fb   :  { %v197_v34 = vpop.eup %196 }
 0x1fc   :  { %v130_v36 = vmul.f32 %v197_v34, %v114_v20 }
 0x1fe   :  { %v139_v38 = vmul.f32 %v170_v35, %v130_v36 }
 0x1ff   :  { %v199_v39 = vpop.eup %198 }
 0x200   :  { %v148_v40 = vadd.f32 %v171_v37, %v139_v38  ;;  %v131_v41 = vmul.f32 %v199_v39, %v115_v24 }
 0x202   :  { %v174_v42 = vpack.c.bf16 %v148_v40, %v148_v40  ;;  %v140_v43 = vmul.f32 %v170_v35, %v131_v41 }
 0x204   :  { %159 = vst.msk [vmem:[%s275_s6] sm:$0xf] %vm158_vm2, %v174_v42  ;;  %v149_v44 = vadd.f32 %v171_v37, %v140_v43 }
 0x206   :  { %v175_v45 = vpack.c.bf16 %v149_v44, %v149_v44 }
 0x208   :  { %160 = vst.msk [vmem:[%s275_s6 + $0x4] sm:$0xf] %vm158_vm2, %v175_v45 }

// kernel: pointer_bert_forward.17
= control target key start
LH: loop header
LB: loop body
LE: loop exit
PB: predicated region body
PF: predicated region fallthrough
CT: control target
= control target key end

     0   :  { %v227_v0 = vmov 0.0   ;;  %vm228_vm0 = vmmov 0   ;;  %vm70_vm1 = vcmask 523264   ;;  %vm121_vm2 = vcmask 261120   ;;  %s301_s1 = inlined_call_operand.vmem [shape: bf16[64,32], index: 1, kind: input, shape index: {}]   ;;  %s302_s0 = inlined_call_operand.vmem [shape: bf16[16,64], index: 0, kind: input, shape index: {}]   ;;  %s303_s3 = inlined_call_operand.vmem [shape: bf16[16,32], index: 3, kind: input, shape index: {}]   ;;  %s304_s2 = inlined_call_operand.vmem [shape: f32[1,32], index: 2, kind: input, shape index: {}]   ;;  %s305_s4 = inlined_call_operand.vmem [shape: f32[1,32], index: 4, kind: input, shape index: {}]   ;;  %s306_s5 = inlined_call_operand.vmem [shape: f32[1,32], index: 5, kind: input, shape index: {}]   ;;  %s307_s6 = inlined_call_operand.vmem [shape: bf16[16,32], index: 6, kind: output, shape index: {}]  }
   0x1   :  { %204 = vmatprep.subr.bf16.mxu0 %v227_v0  ;;  %v218_v1 = vld [vmem:[%s301_s1 + $0x18] sm:$0xff]   ;;  %212 = vmatprep.mubr.msk.bf16.mxu0 %vm228_vm0, %v227_v0  ;;  %v219_v2 = vld [vmem:[%s301_s1 + $0x10] sm:$0xff]   ;;  %v220_v3 = vld [vmem:[%s301_s1 + $0x8] sm:$0xff]   ;;  %vm175_vm3 = vcmask 257024  }
   0x2   :  { %205 = vmatpush3.bf16.msra.mxu0 %v218_v1  ;;  %v221_v4 = vld [vmem:[%s301_s1] sm:$0xff]  }
   0x3   :  { %206 = vmatprep.subr.bf16.mxu0 %v227_v0  ;;  %v222_v5 = vld [vmem:[%s302_s0] sm:$0xff]  }
   0x4   :  { %v196_v6 = vld [vmem:[%s303_s3] sm:$0xff]  }
   0x5   :  { %v182_v7 = vld [vmem:[%s304_s2] ss:$0 sm:$0xff]  ;;  %v197_v8 = vunpack.c.l.bf16 %v196_v6  ;;  %v198_v13 = vunpack.c.h.bf16 %v196_v6 }
   0x6   :  { %207 = vmatpush3.bf16.msra.mxu0 %v219_v2  ;;  %v189_v37 = vld [vmem:[%s305_s4] ss:$0 sm:$0xff] }
   0x7   :  { %208 = vmatprep.subr.bf16.mxu0 %v227_v0  ;;  %v190_v39 = vld [vmem:[%s306_s5] ss:$0 sm:$0xff] }
   0xa   :  { %209 = vmatpush3.bf16.msra.mxu0 %v220_v3 }
   0xb   :  { %210 = vmatprep.subr.bf16.mxu0 %v227_v0 }
   0xe   :  { %211 = vmatpush3.bf16.msra.mxu0 %v221_v4 }
  0x11   :  { %213 = vmatmul.mubr.msk.bf16.vlgmr.msra.gmra.mxu0 %vm70_vm1, %v222_v5 }
  0xd1   :  { %v108_v9 = vpop.f32.mrf.mxu0 }
  0xd2   :  { %v109_v10 = vadd.f32 %v182_v7, %v108_v9 }
  0xd3   :  { %v214_v11 = vpop.f32.mrf.mxu0 }
  0xd4   :  { %v119_v12 = vadd.f32 %v197_v8, %v109_v10 }
  0xd5   :  { %v111_v14 = vpop.f32.mrf.mxu0 }
  0xd6   :  { %v112_v15 = vadd.f32 %v182_v7, %v111_v14  ;;  %v122_v16 = vsel %vm121_vm2, %v119_v12, 0.0 }
  0xd7   :  { %123 = vadd.xlane.f32.xlu0 %v122_v16  ;;  %v215_v17 = vpop.f32.mrf.mxu0 }
  0xd8   :  { %v120_v18 = vadd.f32 %v198_v13, %v112_v15 }
  0xda   :  { %v125_v19 = vsel %vm121_vm2, %v120_v18, 0.0 }
  0xdb   :  { %126 = vadd.xlane.f32.xlu0 %v125_v19 }
 0x160   :  { %v124_v20 = vpop.xlane.xlu0 %123 }
 0x161   :  { %v129_v21 = vmul.f32 0.03125, %v124_v20 }
 0x163   :  { %v131_v22 = vsub.f32 %v119_v12, %v129_v21 }
 0x164   :  { %v127_v23 = vpop.xlane.xlu0 %126 }
 0x165   :  { %v130_v24 = vmul.f32 0.03125, %v127_v23  ;;  %v133_v25 = vmul.f32 %v131_v22, %v131_v22 }
 0x167   :  { %v132_v26 = vsub.f32 %v120_v18, %v130_v24  ;;  %v135_v27 = vsel %vm121_vm2, %v133_v25, 0.0 }
 0x168   :  { %136 = vadd.xlane.f32.xlu1 %v135_v27 }
 0x169   :  { %v134_v28 = vmul.f32 %v132_v26, %v132_v26 }
 0x16b   :  { %v138_v29 = vsel %vm121_vm2, %v134_v28, 0.0 }
 0x16c   :  { %139 = vadd.xlane.f32.xlu1 %v138_v29 }
 0x1f1   :  { %v137_v30 = vpop.xlane.xlu1 %136 }
 0x1f2   :  { %v141_v31 = vmul.f32 0.03125, %v137_v30 }
 0x1f4   :  { %v143_v32 = vadd.f32 1e-12, %v141_v31 }
 0x1f5   :  { %v140_v33 = vpop.xlane.xlu1 %139 }
 0x1f6   :  { %223 = vrsqrt.f32 %v143_v32  ;;  %v142_v34 = vmul.f32 0.03125, %v140_v33 }
 0x1f8   :  { %v144_v35 = vadd.f32 1e-12, %v142_v34 }
 0x1fa   :  { %225 = vrsqrt.f32 %v144_v35 }
 0x203   :  { %v224_v36 = vpop.eup %223 }
 0x204   :  { %v147_v38 = vmul.f32 %v224_v36, %v131_v22 }
 0x206   :  { %v156_v40 = vmul.f32 %v189_v37, %v147_v38 }
 0x207   :  { %v226_v41 = vpop.eup %225 }
 0x208   :  { %v165_v42 = vadd.f32 %v190_v39, %v156_v40  ;;  %v148_v43 = vmul.f32 %v226_v41, %v132_v26 }
 0x20a   :  { %v193_v44 = vpack.c.bf16 %v165_v42, %v165_v42  ;;  %v157_v45 = vmul.f32 %v189_v37, %v148_v43 }
 0x20c   :  { %176 = vst.msk [vmem:[%s307_s6] sm:$0xf] %vm175_vm3, %v193_v44  ;;  %v166_v46 = vadd.f32 %v190_v39, %v157_v45 }
 0x20e   :  { %v194_v47 = vpack.c.bf16 %v166_v46, %v166_v46 }
 0x210   :  { %177 = vst.msk [vmem:[%s307_s6 + $0x4] sm:$0xf] %vm175_vm3, %v194_v47 }

// kernel: pointer_bert_forward.23
= control target key start
LH: loop header
LB: loop body
LE: loop exit
PB: predicated region body
PF: predicated region fallthrough
CT: control target
= control target key end

     0   :  { %v42_v2 = vlaneseq  ;;  %s271_s0 = inlined_call_operand.vmem [shape: bf16[2,8,32], index: 0, kind: input, shape index: {}]   ;;  %s272_s1 = inlined_call_operand.vmem [shape: f32[1,32], index: 1, kind: input, shape index: {}]   ;;  %s273_s2 = inlined_call_operand.vmem [shape: f32[2,8], index: 2, kind: input, shape index: {}]   ;;  %s274_s3 = inlined_call_operand.vmem [shape: s32[2,1], index: 3, kind: input, shape index: {}]   ;;  %s275_s4 = inlined_call_operand.hbm [shape: f32[2,8], index: 4, kind: output, shape index: {0}]   ;;  %s276_s5 = inlined_call_operand.vmem [shape: f32[2,1], index: 5, kind: output, shape index: {1}]  }
   0x1   :  { %v180_v0 = vld [vmem:[%s271_s0] sm:$0xff]  }
   0x2   :  { %v178_v1 = vld [vmem:[%s272_s1] ss:$0 sm:$0xff]  ;;  %v181_v3 = vunpack.c.l.bf16 %v180_v0  ;;  %v182_v4 = vunpack.c.h.bf16 %v180_v0 }
   0x3   :  { %11 = vsyncpa [#allocation3], 0  ;;  %vm34_vm0 = vcmask 261120   ;;  %v43_v5 = vshrl.u32 %v42_v2, 7  ;;  %v23_v8 = vld [vmem:[%s273_s2] sm:$0x3] }
   0x4   :  { %v32_v6 = vmul.f32 %v181_v3, %v178_v1  ;;  %v33_v7 = vmul.f32 %v182_v4, %v178_v1  ;;  %v60_v11 = vsub.f32 1.0, %v23_v8  ;;  %v215_v18 = vmov 0   ;;  %v148_v47 = vld [vmem:[%s274_s3] sm:$0x3]  ;;  %s216_s2 = smov [#allocation2]  }
   0x5   :  { %v44_v9 = vsub.s32 0, %v43_v5  ;;  %v51_v10 = vsub.s32 1, %v43_v5  ;;  %185 = vset.pattern.permute.xlu1 %v215_v18  ;;  %186 = vset.pattern.permute.xlu0 %v215_v18  ;;  %v90_v30 = vand.u32 127, %v42_v2  ;;  %vm99_vm1 = vcmask 1041409   ;;  %s166_s24 = sshll.u32 %s216_s2, 4  ;;  %s167_s24 = int_to_ptr.vmem [resolvable:$true] %s166_s24 }
   0x6   :  { %v35_v12 = vsel %vm34_vm0, %v32_v6, 0.0  ;;  %v38_v14 = vsel %vm34_vm0, %v33_v7, 0.0  ;;  %v61_v16 = vmul.f32 3.4028235e+38, %v60_v11  ;;  %vm102_vm2 = vcmask 58368   ;;  %s193_s3 = scalar_lea.vmem %s167_s24, 32  ;;  %p198_p1 = scmp.lt.s32.totalorder %s167_s24, %s167_s24 }
   0x7   :  { %36 = vadd.xlane.f32.xlu0 %v35_v12  ;;  %v45_v13 = vrot.slane %v23_v8, %v44_v9  ;;  %v52_v15 = vrot.slane %v23_v8, %v51_v10  ;;  %v93_v32 = vsub.s32 %v90_v30, %v43_v5  ;;  %p194_p0 = scmp.ne.s32.totalorder %s167_s24, %s193_s3  ;;  %p199_p2 = scmp.lt.s32.totalorder %s193_s3, %s193_s3 }
   0x8   :  { %v73_v17 = vrot.slane %v61_v16, %v51_v10  ;;  %v66_v19 = vrot.slane %v61_v16, %v44_v9 }
   0x9   :  { %47 = vbcast.lane.b32.xlu1 %v45_v13, 256  ;;  %p200_p3 = por %p199_p2, %p198_p1 }
   0xb   :  { %39 = vadd.xlane.f32.xlu0 %v38_v14  ;;  %p201_p4 = pnand %p200_p3, %p194_p0 }
   0xd   :  { %54 = vbcast.lane.b32.xlu1 %v52_v15, 256 }
  0x11   :  { %75 = vbcast.lane.b32.xlu1 %v73_v17, 256 }
  0x21   :  { %68 = vbcast.lane.b32.xlu0 %v66_v19, 256 }
  0x7b   :  { %v48_v20 = vpop.permute.xlu1 %47 }
  0x7f   :  { %v55_v22 = vpop.permute.xlu1 %54 }
  0x83   :  { %v76_v28 = vpop.permute.xlu1 %75 }
  0x90   :  { %v37_v21 = vpop.xlane.xlu0 %36 }
  0x91   :  { %v58_v24 = vmul.f32 %v48_v20, %v37_v21 }
  0x94   :  { %v40_v23 = vpop.xlane.xlu0 %39 }
  0x95   :  { %v59_v26 = vmul.f32 %v55_v22, %v40_v23 }
  0x97   :  { %v80_v29 = vsub.f32 %v59_v26, %v76_v28 }
  0x98   :  { %v69_v25 = vpop.permute.xlu0 %68 }
  0x99   :  { %v79_v27 = vsub.f32 %v58_v24, %v69_v25 }
  0x9b   :  { %84 = vperm.xlu1 %185, %v79_v27  }
  0x9f   :  { %87 = vperm.xlu1 %185, %v80_v29  }
 0x116   :  { %v85_v31 = vpop.permute.xlu1 %84 }
 0x117   :  { %v94_v34 = vrot.slane %v85_v31, %v93_v32 }
 0x11a   :  { %v88_v33 = vpop.permute.xlu1 %87 }
 0x11b   :  { %v98_v35 = vrot.slane %v88_v33, %v93_v32 }
 0x11d   :  { %v100_v36 = vsel %vm99_vm1, %v98_v35, %v94_v34 }
 0x11e   :  { %v104_v37 = vsel %vm102_vm2, %v100_v36, -inf  ;;  %103 = vst.msk [vmem:[#allocation2] sm:$0x3] %vm102_vm2, %v100_v36 }
 0x11f   :  { %105 = vmax.xlane.f32.xlu1 %v104_v37 }
 0x1a8   :  { %v106_v38 = vpop.xlane.xlu1 %105 }
 0x1a9   :  { %v111_v39 = vrot.slane %v106_v38, %v44_v9  ;;  %v115_v40 = vrot.slane %v106_v38, %v51_v10 }
 0x1ab   :  { %v118_v41 = vsub.f32 %v79_v27, %v111_v39  ;;  %v119_v42 = vsub.f32 %v80_v29, %v115_v40 }
 0x1ad   :  { %v120_v43 = vmul.f32 1.442695, %v118_v41  ;;  %v122_v44 = vmul.f32 1.442695, %v119_v42 }
 0x1af   :  { %187 = vpow2.f32 %v120_v43 }
 0x1b0   :  { %189 = vpow2.f32 %v122_v44 }
 0x1bc   :  { %v188_v45 = vpop.eup %187 }
 0x1bd   :  { %127 = vperm.xlu0 %186, %v188_v45   ;;  %v190_v46 = vpop.eup %189 }
 0x1c1   :  { %130 = vperm.xlu0 %186, %v190_v46  }
 0x1c5   :  { %150 = vperm.xlu0 %186, %v148_v47  }
 0x238   :  { %v128_v48 = vpop.permute.xlu0 %127 }
 0x239   :  { %v135_v50 = vrot.slane %v128_v48, %v93_v32 }
 0x23c   :  { %v131_v49 = vpop.permute.xlu0 %130 }
 0x23d   :  { %v139_v51 = vrot.slane %v131_v49, %v93_v32 }
 0x23f   :  { %v140_v52 = vsel %vm99_vm1, %v139_v51, %v135_v50 }
 0x240   :  { %v151_v53 = vpop.permute.xlu0 %150  ;;  %v142_v54 = vsel %vm102_vm2, %v140_v52, 0.0 }
 0x241   :  { %vm152_vm3 = vcmp.eq.s32.totalorder %v90_v30, %v151_v53  ;;  %143 = vadd.xlane.f32.xlu0 %v142_v54 }
 0x242   :  { %v153_v55 = vsel %vm152_vm3, %v100_v36, 0.0 }
 0x243   :  { %v154_v56 = vsel %vm102_vm2, %v153_v55, 0.0 }
 0x244   :  { %155 = vadd.xlane.f32.xlu1 %v154_v56 }
 0x245   :  { %204 = shalt.err (!%p201_p4)
}
 0x246   :  { %169 = dma.vmem_to_hbm [thread:$0]  %s167_s24, 32, %s275_s4, [#allocation3]   ;;  %vm158_vm4 = vcmask 1024  }
 0x2ca   :  { %v144_v57 = vpop.xlane.xlu0 %143 }
 0x2cb   :  { %191 = vlog2.f32 %v144_v57 }
 0x2cd   :  { %v156_v61 = vpop.xlane.xlu1 %155 }
 0x2d8   :  { %v192_v58 = vpop.eup %191 }
 0x2d9   :  { %v146_v59 = vmul.f32 0.6931472, %v192_v58 }
 0x2db   :  { %v147_v60 = vadd.f32 %v146_v59, %v106_v38 }
 0x2dd   :  { %v157_v62 = vsub.f32 %v147_v60, %v156_v61 }
 0x2df   :  { %159 = vst.msk [vmem:[%s276_s5] sm:$0x3] %vm158_vm4, %v157_v62 }
 0x2e0   :  { %213 = dma.done.wait [#allocation3], 32  }
 0x2e1   :  { %214 = vsyncadd [#allocation3], 4294967264 }
 0x2e2   :  { %177 = vsyncpa [#allocation3], 1 }

// kernel: pointer_bert_forward.16
= control target key start
LH: loop header
LB: loop body
LE: loop exit
PB: predicated region body
PF: predicated region fallthrough
CT: control target
= control target key end

     0   :  { %v152_v0 = vmov 0.0   ;;  %vm153_vm0 = vmmov 0   ;;  %vm45_vm1 = vcmask 261120   ;;  %vm116_vm2 = vcmask 519168   ;;  %s192_s1 = inlined_call_operand.vmem [shape: bf16[32,64], index: 1, kind: input, shape index: {}]   ;;  %s193_s0 = inlined_call_operand.vmem [shape: bf16[16,32], index: 0, kind: input, shape index: {}]   ;;  %s194_s2 = inlined_call_operand.vmem [shape: f32[1,64], index: 2, kind: input, shape index: {}]   ;;  %s195_s3 = inlined_call_operand.vmem [shape: bf16[16,64], index: 3, kind: output, shape index: {}]  }
   0x1   :  { %135 = vmatprep.subr.bf16.mxu0 %v152_v0  ;;  %v145_v1 = vld [vmem:[%s192_s1 + $0x8] sm:$0xff]   ;;  %139 = vmatprep.mubr.msk.bf16.mxu0 %vm153_vm0, %v152_v0  ;;  %v146_v2 = vld [vmem:[%s192_s1] sm:$0xff]  }
   0x2   :  { %136 = vmatpush3.bf16.msra.mxu0 %v145_v1  ;;  %v147_v3 = vld [vmem:[%s193_s0] sm:$0xff]  }
   0x3   :  { %137 = vmatprep.subr.bf16.mxu0 %v152_v0  ;;  %v123_v4 = vld [vmem:[%s194_s2] ss:$0 sm:$0xff] }
   0x6   :  { %138 = vmatpush3.bf16.msra.mxu0 %v146_v2 }
   0x9   :  { %140 = vmatmul.mubr.msk.bf16.vlgmr.msra.gmra.mxu0 %vm45_vm1, %v147_v3 }
  0xc9   :  { %v83_v5 = vpop.f32.mrf.mxu0 }
  0xca   :  { %v84_v6 = vadd.f32 %v123_v4, %v83_v5 }
  0xcb   :  { %v141_v7 = vpop.f32.mrf.mxu0 }
  0xcc   :  { %v92_v8 = vmul.f32 0.044715, %v84_v6  ;;  %v90_v22 = vmul.f32 0.5, %v84_v6 }
  0xcd   :  { %v86_v9 = vpop.f32.mrf.mxu0 }
  0xce   :  { %v94_v10 = vmul.f32 %v92_v8, %v84_v6  ;;  %v87_v11 = vadd.f32 %v123_v4, %v86_v9 }
  0xcf   :  { %v142_v12 = vpop.f32.mrf.mxu0 }
  0xd0   :  { %v96_v13 = vmul.f32 %v94_v10, %v84_v6  ;;  %v93_v14 = vmul.f32 0.044715, %v87_v11  ;;  %v91_v27 = vmul.f32 0.5, %v87_v11 }
  0xd2   :  { %v98_v15 = vadd.f32 %v96_v13, %v84_v6  ;;  %v95_v16 = vmul.f32 %v93_v14, %v87_v11 }
  0xd4   :  { %v100_v17 = vmul.f32 0.7978846, %v98_v15  ;;  %v97_v18 = vmul.f32 %v95_v16, %v87_v11 }
  0xd6   :  { %148 = vtanh.f32 %v100_v17  ;;  %v99_v19 = vadd.f32 %v97_v18, %v87_v11 }
  0xd8   :  { %v101_v20 = vmul.f32 0.7978846, %v99_v19 }
  0xda   :  { %150 = vtanh.f32 %v101_v20 }
  0xe3   :  { %v149_v21 = vpop.eup %148 }
  0xe4   :  { %v104_v23 = vadd.f32 1.0, %v149_v21 }
  0xe6   :  { %v106_v24 = vmul.f32 %v104_v23, %v90_v22 }
  0xe7   :  { %v151_v25 = vpop.eup %150 }
  0xe8   :  { %v130_v26 = vpack.c.bf16 %v106_v24, %v106_v24  ;;  %v105_v28 = vadd.f32 1.0, %v151_v25 }
  0xea   :  { %117 = vst.msk [vmem:[%s195_s3] sm:$0xf] %vm116_vm2, %v130_v26  ;;  %v107_v29 = vmul.f32 %v105_v28, %v91_v27 }
  0xec   :  { %v131_v30 = vpack.c.bf16 %v107_v29, %v107_v29 }
  0xee   :  { %118 = vst.msk [vmem:[%s195_s3 + $0x4] sm:$0xf] %vm116_vm2, %v131_v30 }

</bundles_post_ra>
